<compile_context>
chip_gen: v7x
topology: tpu7x:2x2x1
jax: 0.10.0
libtpu: 0.0.40
codegen_flags: <defaults>
</compile_context>

<pallas_src>
import jax
import jax.numpy as jnp
from jax import lax
from jax.experimental import pallas as pl
from jax.experimental.pallas import tpu as pltpu

# ---------------- model sizes -------------------------------------------------
B = 2          # real batch
B_PAD = 8      # batch padded to a full sublane group
T = 8          # text sequence length
VOCAB = 100
N_SEG = 2
E = 32         # token embedding dim
H = 32         # LSTM hidden dim  (4*H == 128 == one full lane group)
G = 4 * H      # 128
D_IMG = 64
R = 4
H_IMG = 32
H_CLF = 64
C = 4          # number of classes (== len(scaling_factors))
C_PAD = 128    # lane-dense output slab


# ---------------- fused Pallas kernel -----------------------------------------
def _mttv_kernel(x_ref, m_ref, img_ref, reg_ref,
                 wih_ref, whh_ref, blstm_ref,
                 wimg_a_ref, wimg_b_ref, bimg_ref,
                 w1txt_ref, w1img_ref, b1_ref,
                 w2_ref, b2_ref, scale_ref,
                 out_ref, gx_ref):
    f32 = jnp.float32

    # (1) hoisted input projection: all T timesteps in ONE MXU matmul (+ bias).
    gx_ref[...] = (jnp.dot(x_ref[...], wih_ref[...], preferred_element_type=f32)
                   + blstm_ref[...])                                   # [T*B_PAD, 4H]

    # (2) image branch (independent of the recurrence; split weights avoid a
    #     lane-axis concat of [img | pooled_regions]).
    pooled = jnp.mean(reg_ref[...], axis=1)                            # [B_PAD, D_IMG]
    h_img = jnp.maximum(
        jnp.dot(img_ref[...], wimg_a_ref[...], preferred_element_type=f32)
        + jnp.dot(pooled, wimg_b_ref[...], preferred_element_type=f32)
        + bimg_ref[...], 0.0)                                          # [B_PAD, H_IMG]

    # (3) masked LSTM recurrence, fully unrolled in-kernel.
    #     State vregs are [B_PAD, 4H]; only lanes [0, H) hold the real h / c.
    #     The remaining lanes carry bounded junk that is annihilated by the
    #     zero rows of whh_pad (here) and w1_txt_pad (classifier).
    whh = whh_ref[...]                                                 # [4H, 4H]

    def step(t, carry):
        h_p, c_p = carry
        off = pl.multiple_of(t * B_PAD, B_PAD)
        gx_t = gx_ref[pl.ds(off, B_PAD), :]                            # [B_PAD, 4H]
        m_t = m_ref[pl.ds(off, B_PAD), :]                              # [B_PAD, 4H]

        gates = gx_t + jnp.dot(h_p, whh, preferred_element_type=f32)   # [B_PAD, 4H]
        sig = jax.nn.sigmoid(gates)        # full-vreg EUP (i, f, o live here)
        th = jnp.tanh(gates)               # full-vreg EUP (g lives here)

        # align f / g / o to lane block 0 via XLU rotations (no 32-lane slices)
        f0 = pltpu.roll(sig, 3 * H, 1)     # block0 <- f  (lanes [H, 2H))
        g0 = pltpu.roll(th, 2 * H, 1)      # block0 <- g  (lanes [2H, 3H))
        o0 = pltpu.roll(sig, H, 1)         # block0 <- o  (lanes [3H, 4H))

        c_new = f0 * c_p + sig * g0        # block0: f*c_prev + i*g
        h_new = o0 * jnp.tanh(c_new)       # block0: o*tanh(c_new)

        # masked carry: padded timesteps / padded batch rows keep previous state
        c_p = m_t * c_new + (1.0 - m_t) * c_p
        h_p = m_t * h_new + (1.0 - m_t) * h_p
        return h_p, c_p

    zeros = jnp.zeros((B_PAD, G), f32)
    h_p, _ = lax.fori_loop(0, T, step, (zeros, zeros), unroll=True)

    # (4) classifier: split-weight matmuls instead of concat([h_txt, h_img]).
    #     w1txt is zero-padded to [4H, H_CLF] so h_p's junk lanes contribute 0.
    hidden = jnp.maximum(
        jnp.dot(h_p, w1txt_ref[...], preferred_element_type=f32)
        + jnp.dot(h_img, w1img_ref[...], preferred_element_type=f32)
        + b1_ref[...], 0.0)                                            # [B_PAD, H_CLF]

    logits = (jnp.dot(hidden, w2_ref[...], preferred_element_type=f32)
              + b2_ref[...]) * scale_ref[...]                          # [B_PAD, C_PAD]

    # (5) softmax over the real C lanes only (padded class lanes -> ~0),
    #     stored as a lane-dense [B_PAD, 128] slab (unmasked vst).
    lane = lax.broadcasted_iota(jnp.int32, (B_PAD, C_PAD), 1)
    logits = jnp.where(lane < C, logits, -1e30)
    logits = logits - jnp.max(logits, axis=-1, keepdims=True)
    e = jnp.exp(logits)
    denom = jnp.sum(e, axis=-1, keepdims=True)
    out_ref[...] = e * pl.reciprocal(denom, approx=True)


# ---------------- parameters (deterministic, synthetic) ------------------------
def init_params(key):
    ks = jax.random.split(key, 8)

    def nrm(k, shape, scale=0.05):
        return scale * jax.random.normal(k, shape, dtype=jnp.float32)

    return {
        "tok_emb": nrm(ks[0], (VOCAB, E)),
        "seg_emb": nrm(ks[1], (N_SEG, E)),
        "w_ih": nrm(ks[2], (E, 4 * H)),
        "w_hh": nrm(ks[3], (H, 4 * H)),
        "b_lstm": jnp.zeros((1, 4 * H), jnp.float32),
        "w_img": nrm(ks[4], (2 * D_IMG, H_IMG)),
        "b_img": jnp.zeros((1, H_IMG), jnp.float32),
        "w1": nrm(ks[5], (H + H_IMG, H_CLF)),
        "b1": jnp.zeros((1, H_CLF), jnp.float32),
        "w2": nrm(ks[6], (H_CLF, C)),
        "b2": jnp.zeros((1, C), jnp.float32),
        # the scaling_factors Parameter of MTTV_WithScalableClassifier
        "scale": jnp.array([[1.0, 0.5, 2.0, 1.5]], jnp.float32),
    }


def _prep_weights(p):
    """Wrapper-side layout plumbing: split concat-weights, zero-pad for the
    full-vreg state trick and the lane-dense output slab."""
    whh_pad = jnp.zeros((G, G), jnp.float32).at[:H, :].set(p["w_hh"])
    w_img_a = p["w_img"][:D_IMG, :]          # multiplies img
    w_img_b = p["w_img"][D_IMG:, :]          # multiplies mean-pooled regions
    w1_txt = jnp.zeros((G, H_CLF), jnp.float32).at[:H, :].set(p["w1"][:H, :])
    w1_img = p["w1"][H:, :]
    w2_pad = jnp.zeros((H_CLF, C_PAD), jnp.float32).at[:, :C].set(p["w2"])
    b2_pad = jnp.zeros((1, C_PAD), jnp.float32).at[:, :C].set(p["b2"])
    scale_pad = jnp.ones((1, C_PAD), jnp.float32).at[:, :C].set(p["scale"])
    return (p["w_ih"], whh_pad, p["b_lstm"],
            w_img_a, w_img_b, p["b_img"],
            w1_txt, w1_img, p["b1"],
            w2_pad, b2_pad, scale_pad)


# ---------------- forward (embedding gather in JAX, everything else fused) -----
def forward(params, txt, mask, segment, img, regions):
    # TODO(synk): token/segment embedding lookup (gather) stays in the wrapper;
    # a tiny data-dependent gather has no clean/worthwhile Pallas equivalent here.
    x = params["tok_emb"][txt] + params["seg_emb"][segment]             # [B, T, E]
    x_tm = jnp.transpose(x, (1, 0, 2)).astype(jnp.float32)              # [T, B, E]
    x_tm = jnp.pad(x_tm, ((0, 0), (0, B_PAD - B), (0, 0)))              # [T, B_PAD, E]
    x2d = x_tm.reshape(T * B_PAD, E)

    m_tm = jnp.transpose(mask, (1, 0)).astype(jnp.float32)              # [T, B]
    m_tm = jnp.pad(m_tm, ((0, 0), (0, B_PAD - B)))                      # [T, B_PAD]
    m2d = jnp.broadcast_to(m_tm.reshape(T * B_PAD, 1), (T * B_PAD, G))  # lane-dense

    img_p = jnp.pad(img.astype(jnp.float32), ((0, B_PAD - B), (0, 0)))
    reg_p = jnp.pad(regions.astype(jnp.float32),
                    ((0, B_PAD - B), (0, 0), (0, 0)))

    w = _prep_weights(params)

    out_pad = pl.pallas_call(
        _mttv_kernel,
        out_shape=jax.ShapeDtypeStruct((B_PAD, C_PAD), jnp.float32),
        scratch_shapes=[pltpu.VMEM((T * B_PAD, G), jnp.float32)],       # hoisted x@W_ih
    )(x2d, m2d, img_p, reg_p, *w)

    return out_pad[:B, :C]                                              # [B, C]


if __name__ == "__main__":
    key = jax.random.PRNGKey(0)
    kp, kt, ki, kr = jax.random.split(key, 4)

    params = init_params(kp)

    txt = jax.random.randint(kt, (B, T), 0, VOCAB, dtype=jnp.int32)
    segment = jnp.zeros((B, T), jnp.int32)
    lengths = jnp.array([T, T - 3], jnp.int32)
    mask = (jnp.arange(T)[None, :] < lengths[:, None]).astype(jnp.float32)
    img = jax.random.normal(ki, (B, D_IMG), dtype=jnp.float32)
    regions = jax.random.normal(kr, (B, R, D_IMG), dtype=jnp.float32)

    out = jax.jit(forward)(params, txt, mask, segment, img, regions)
    out = jax.block_until_ready(out)

    assert out.shape == (B, C)
    assert bool(jnp.all(jnp.isfinite(out)))
    # rows of a softmax must sum to 1 (approx reciprocal -> ~1e-4 tolerance)
    assert bool(jnp.allclose(jnp.sum(out, axis=-1), 1.0, atol=1e-3))
    print("KERNEL_OK")
</pallas_src>

<mosaic_0001>
module attributes {stable_mosaic.version = 11 : i64} {
  func.func @_mttv_kernel(%arg0: memref<64x32xf32, #tpu.memory_space<vmem>>, %arg1: memref<64x128xf32, #tpu.memory_space<vmem>>, %arg2: memref<8x64xf32, #tpu.memory_space<vmem>>, %arg3: memref<8x4x64xf32, #tpu.memory_space<vmem>>, %arg4: memref<32x128xf32, #tpu.memory_space<vmem>>, %arg5: memref<128x128xf32, #tpu.memory_space<vmem>>, %arg6: memref<1x128xf32, #tpu.memory_space<vmem>>, %arg7: memref<64x32xf32, #tpu.memory_space<vmem>>, %arg8: memref<64x32xf32, #tpu.memory_space<vmem>>, %arg9: memref<1x32xf32, #tpu.memory_space<vmem>>, %arg10: memref<128x64xf32, #tpu.memory_space<vmem>>, %arg11: memref<32x64xf32, #tpu.memory_space<vmem>>, %arg12: memref<1x64xf32, #tpu.memory_space<vmem>>, %arg13: memref<64x128xf32, #tpu.memory_space<vmem>>, %arg14: memref<1x128xf32, #tpu.memory_space<vmem>>, %arg15: memref<1x128xf32, #tpu.memory_space<vmem>>, %arg16: memref<8x128xf32, #tpu.memory_space<vmem>>, %arg17: memref<64x128xf32, #tpu.memory_space<vmem>>) attributes {dimension_semantics = [], scalar_prefetch = 0 : i64, scratch_operands = 1 : i64, tpu.core_type = #tpu.core_type<tc>} {
    %c0 = arith.constant 0 : index
    %c0_0 = arith.constant 0 : index
    %0 = vector.load %arg0[%c0, %c0_0] : memref<64x32xf32, #tpu.memory_space<vmem>>, vector<64x32xf32>
    %c0_1 = arith.constant 0 : index
    %c0_2 = arith.constant 0 : index
    %1 = vector.load %arg4[%c0_1, %c0_2] : memref<32x128xf32, #tpu.memory_space<vmem>>, vector<32x128xf32>
    %cst = arith.constant dense<0.000000e+00> : vector<64x128xf32>
    %2 = tpu.matmul %0, %1, %cst {dimension_numbers = #tpu.dot_dimension_numbers<[1], [0], [0], [1], [0, 0, 1, 1], [], []>} : vector<64x32xf32>, vector<32x128xf32>, vector<64x128xf32> -> vector<64x128xf32>
    %c0_3 = arith.constant 0 : index
    %c0_4 = arith.constant 0 : index
    %3 = vector.load %arg6[%c0_3, %c0_4] : memref<1x128xf32, #tpu.memory_space<vmem>>, vector<1x128xf32>
    %4 = vector.broadcast %3 : vector<1x128xf32> to vector<64x128xf32>
    %5 = arith.addf %2, %4 : vector<64x128xf32>
    %c0_5 = arith.constant 0 : index
    %c0_6 = arith.constant 0 : index
    %6 = vector.load %arg17[%c0_5, %c0_6] : memref<64x128xf32, #tpu.memory_space<vmem>>, vector<64x128xf32>
    tpu.vector_store %arg17[%c0_5, %c0_6], %5 {strides = array<i32>} : memref<64x128xf32, #tpu.memory_space<vmem>>, vector<64x128xf32>,
    %c0_7 = arith.constant 0 : index
    %c0_8 = arith.constant 0 : index
    %c0_9 = arith.constant 0 : index
    %7 = vector.load %arg3[%c0_7, %c0_8, %c0_9] : memref<8x4x64xf32, #tpu.memory_space<vmem>>, vector<8x4x64xf32>
    %cst_10 = arith.constant dense<0.000000e+00> : vector<8x64xf32>
    %8 = vector.multi_reduction <add>, %7, %cst_10 [1] : vector<8x4x64xf32> to vector<8x64xf32>
    %cst_11 = arith.constant 4.000000e+00 : f32
    %9 = vector.broadcast %cst_11 : f32 to vector<8x64xf32>
    %10 = arith.divf %8, %9 : vector<8x64xf32>
    %c0_12 = arith.constant 0 : index
    %c0_13 = arith.constant 0 : index
    %11 = vector.load %arg2[%c0_12, %c0_13] : memref<8x64xf32, #tpu.memory_space<vmem>>, vector<8x64xf32>
    %c0_14 = arith.constant 0 : index
    %c0_15 = arith.constant 0 : index
    %12 = vector.load %arg7[%c0_14, %c0_15] : memref<64x32xf32, #tpu.memory_space<vmem>>, vector<64x32xf32>
    %cst_16 = arith.constant dense<0.000000e+00> : vector<8x32xf32>
    %13 = tpu.matmul %11, %12, %cst_16 {dimension_numbers = #tpu.dot_dimension_numbers<[1], [0], [0], [1], [0, 0, 1, 1], [], []>} : vector<8x64xf32>, vector<64x32xf32>, vector<8x32xf32> -> vector<8x32xf32>
    %c0_17 = arith.constant 0 : index
    %c0_18 = arith.constant 0 : index
    %14 = vector.load %arg8[%c0_17, %c0_18] : memref<64x32xf32, #tpu.memory_space<vmem>>, vector<64x32xf32>
    %cst_19 = arith.constant dense<0.000000e+00> : vector<8x32xf32>
    %15 = tpu.matmul %10, %14, %cst_19 {dimension_numbers = #tpu.dot_dimension_numbers<[1], [0], [0], [1], [0, 0, 1, 1], [], []>} : vector<8x64xf32>, vector<64x32xf32>, vector<8x32xf32> -> vector<8x32xf32>
    %16 = arith.addf %13, %15 : vector<8x32xf32>
    %c0_20 = arith.constant 0 : index
    %c0_21 = arith.constant 0 : index
    %17 = vector.load %arg9[%c0_20, %c0_21] : memref<1x32xf32, #tpu.memory_space<vmem>>, vector<1x32xf32>
    %18 = vector.broadcast %17 : vector<1x32xf32> to vector<8x32xf32>
    %19 = arith.addf %16, %18 : vector<8x32xf32>
    %cst_22 = arith.constant 0.000000e+00 : f32
    %20 = vector.broadcast %cst_22 : f32 to vector<8x32xf32>
    %21 = arith.maximumf %19, %20 : vector<8x32xf32>
    %c0_23 = arith.constant 0 : index
    %c0_24 = arith.constant 0 : index
    %22 = vector.load %arg5[%c0_23, %c0_24] : memref<128x128xf32, #tpu.memory_space<vmem>>, vector<128x128xf32>
    %cst_25 = arith.constant 0.000000e+00 : f32
    %23 = vector.broadcast %cst_25 : f32 to vector<8x128xf32>
    %c0_i32 = arith.constant 0 : i32
    %c8_i32 = arith.constant 8 : i32
    %24 = arith.muli %c0_i32, %c8_i32 : i32
    %25 = tpu.assume_multiple %24, 8 : i32
    %26 = arith.index_cast %25 : i32 to index
    %c0_26 = arith.constant 0 : index
    %27 = vector.load %arg17[%26, %c0_26] : memref<64x128xf32, #tpu.memory_space<vmem>>, vector<8x128xf32>
    %28 = arith.index_cast %25 : i32 to index
    %c0_27 = arith.constant 0 : index
    %29 = vector.load %arg1[%28, %c0_27] : memref<64x128xf32, #tpu.memory_space<vmem>>, vector<8x128xf32>
    %cst_28 = arith.constant dense<0.000000e+00> : vector<8x128xf32>
    %30 = tpu.matmul %23, %22, %cst_28 {dimension_numbers = #tpu.dot_dimension_numbers<[1], [0], [0], [1], [0, 0, 1, 1], [], []>} : vector<8x128xf32>, vector<128x128xf32>, vector<8x128xf32> -> vector<8x128xf32>
    %31 = arith.addf %27, %30 : vector<8x128xf32>
    %32 = arith.negf %31 : vector<8x128xf32>
    %33 = math.exp %32 : vector<8x128xf32>
    %cst_29 = arith.constant 1.000000e+00 : f32
    %34 = vector.broadcast %cst_29 : f32 to vector<8x128xf32>
    %35 = arith.addf %34, %33 : vector<8x128xf32>
    %36 = arith.divf %34, %35 : vector<8x128xf32>
    %37 = math.tanh %31 : vector<8x128xf32>
    %c96_i32 = arith.constant 96 : i32
    %38 = tpu.dynamic_rotate %36 by %c96_i32 dim 1 : vector<8x128xf32>, i32 -> vector<8x128xf32>
    %c64_i32 = arith.constant 64 : i32
    %39 = tpu.dynamic_rotate %37 by %c64_i32 dim 1 : vector<8x128xf32>, i32 -> vector<8x128xf32>
    %c32_i32 = arith.constant 32 : i32
    %40 = tpu.dynamic_rotate %36 by %c32_i32 dim 1 : vector<8x128xf32>, i32 -> vector<8x128xf32>
    %41 = arith.mulf %38, %23 : vector<8x128xf32>
    %42 = arith.mulf %36, %39 : vector<8x128xf32>
    %43 = arith.addf %41, %42 : vector<8x128xf32>
    %44 = math.tanh %43 : vector<8x128xf32>
    %45 = arith.mulf %40, %44 : vector<8x128xf32>
    %46 = arith.mulf %29, %43 : vector<8x128xf32>
    %cst_30 = arith.constant 1.000000e+00 : f32
    %47 = vector.broadcast %cst_30 : f32 to vector<8x128xf32>
    %48 = arith.subf %47, %29 : vector<8x128xf32>
    %49 = arith.mulf %48, %23 : vector<8x128xf32>
    %50 = arith.addf %46, %49 : vector<8x128xf32>
    %51 = arith.mulf %29, %45 : vector<8x128xf32>
    %cst_31 = arith.constant 1.000000e+00 : f32
    %52 = vector.broadcast %cst_31 : f32 to vector<8x128xf32>
    %53 = arith.subf %52, %29 : vector<8x128xf32>
    %54 = arith.mulf %53, %23 : vector<8x128xf32>
    %55 = arith.addf %51, %54 : vector<8x128xf32>
    %c1_i32 = arith.constant 1 : i32
    %c8_i32_32 = arith.constant 8 : i32
    %56 = arith.muli %c1_i32, %c8_i32_32 : i32
    %57 = tpu.assume_multiple %56, 8 : i32
    %58 = arith.index_cast %57 : i32 to index
    %c0_33 = arith.constant 0 : index
    %59 = vector.load %arg17[%58, %c0_33] : memref<64x128xf32, #tpu.memory_space<vmem>>, vector<8x128xf32>
    %60 = arith.index_cast %57 : i32 to index
    %c0_34 = arith.constant 0 : index
    %61 = vector.load %arg1[%60, %c0_34] : memref<64x128xf32, #tpu.memory_space<vmem>>, vector<8x128xf32>
    %cst_35 = arith.constant dense<0.000000e+00> : vector<8x128xf32>
    %62 = tpu.matmul %55, %22, %cst_35 {dimension_numbers = #tpu.dot_dimension_numbers<[1], [0], [0], [1], [0, 0, 1, 1], [], []>} : vector<8x128xf32>, vector<128x128xf32>, vector<8x128xf32> -> vector<8x128xf32>
    %63 = arith.addf %59, %62 : vector<8x128xf32>
    %64 = arith.negf %63 : vector<8x128xf32>
    %65 = math.exp %64 : vector<8x128xf32>
    %cst_36 = arith.constant 1.000000e+00 : f32
    %66 = vector.broadcast %cst_36 : f32 to vector<8x128xf32>
    %67 = arith.addf %66, %65 : vector<8x128xf32>
    %68 = arith.divf %66, %67 : vector<8x128xf32>
    %69 = math.tanh %63 : vector<8x128xf32>
    %c96_i32_37 = arith.constant 96 : i32
    %70 = tpu.dynamic_rotate %68 by %c96_i32_37 dim 1 : vector<8x128xf32>, i32 -> vector<8x128xf32>
    %c64_i32_38 = arith.constant 64 : i32
    %71 = tpu.dynamic_rotate %69 by %c64_i32_38 dim 1 : vector<8x128xf32>, i32 -> vector<8x128xf32>
    %c32_i32_39 = arith.constant 32 : i32
    %72 = tpu.dynamic_rotate %68 by %c32_i32_39 dim 1 : vector<8x128xf32>, i32 -> vector<8x128xf32>
    %73 = arith.mulf %70, %50 : vector<8x128xf32>
    %74 = arith.mulf %68, %71 : vector<8x128xf32>
    %75 = arith.addf %73, %74 : vector<8x128xf32>
    %76 = math.tanh %75 : vector<8x128xf32>
    %77 = arith.mulf %72, %76 : vector<8x128xf32>
    %78 = arith.mulf %61, %75 : vector<8x128xf32>
    %cst_40 = arith.constant 1.000000e+00 : f32
    %79 = vector.broadcast %cst_40 : f32 to vector<8x128xf32>
    %80 = arith.subf %79, %61 : vector<8x128xf32>
    %81 = arith.mulf %80, %50 : vector<8x128xf32>
    %82 = arith.addf %78, %81 : vector<8x128xf32>
    %83 = arith.mulf %61, %77 : vector<8x128xf32>
    %cst_41 = arith.constant 1.000000e+00 : f32
    %84 = vector.broadcast %cst_41 : f32 to vector<8x128xf32>
    %85 = arith.subf %84, %61 : vector<8x128xf32>
    %86 = arith.mulf %85, %55 : vector<8x128xf32>
    %87 = arith.addf %83, %86 : vector<8x128xf32>
    %c2_i32 = arith.constant 2 : i32
    %c8_i32_42 = arith.constant 8 : i32
    %88 = arith.muli %c2_i32, %c8_i32_42 : i32
    %89 = tpu.assume_multiple %88, 8 : i32
    %90 = arith.index_cast %89 : i32 to index
    %c0_43 = arith.constant 0 : index
    %91 = vector.load %arg17[%90, %c0_43] : memref<64x128xf32, #tpu.memory_space<vmem>>, vector<8x128xf32>
    %92 = arith.index_cast %89 : i32 to index
    %c0_44 = arith.constant 0 : index
    %93 = vector.load %arg1[%92, %c0_44] : memref<64x128xf32, #tpu.memory_space<vmem>>, vector<8x128xf32>
    %cst_45 = arith.constant dense<0.000000e+00> : vector<8x128xf32>
    %94 = tpu.matmul %87, %22, %cst_45 {dimension_numbers = #tpu.dot_dimension_numbers<[1], [0], [0], [1], [0, 0, 1, 1], [], []>} : vector<8x128xf32>, vector<128x128xf32>, vector<8x128xf32> -> vector<8x128xf32>
    %95 = arith.addf %91, %94 : vector<8x128xf32>
    %96 = arith.negf %95 : vector<8x128xf32>
    %97 = math.exp %96 : vector<8x128xf32>
    %cst_46 = arith.constant 1.000000e+00 : f32
    %98 = vector.broadcast %cst_46 : f32 to vector<8x128xf32>
    %99 = arith.addf %98, %97 : vector<8x128xf32>
    %100 = arith.divf %98, %99 : vector<8x128xf32>
    %101 = math.tanh %95 : vector<8x128xf32>
    %c96_i32_47 = arith.constant 96 : i32
    %102 = tpu.dynamic_rotate %100 by %c96_i32_47 dim 1 : vector<8x128xf32>, i32 -> vector<8x128xf32>
    %c64_i32_48 = arith.constant 64 : i32
    %103 = tpu.dynamic_rotate %101 by %c64_i32_48 dim 1 : vector<8x128xf32>, i32 -> vector<8x128xf32>
    %c32_i32_49 = arith.constant 32 : i32
    %104 = tpu.dynamic_rotate %100 by %c32_i32_49 dim 1 : vector<8x128xf32>, i32 -> vector<8x128xf32>
    %105 = arith.mulf %102, %82 : vector<8x128xf32>
    %106 = arith.mulf %100, %103 : vector<8x128xf32>
    %107 = arith.addf %105, %106 : vector<8x128xf32>
    %108 = math.tanh %107 : vector<8x128xf32>
    %109 = arith.mulf %104, %108 : vector<8x128xf32>
    %110 = arith.mulf %93, %107 : vector<8x128xf32>
    %cst_50 = arith.constant 1.000000e+00 : f32
    %111 = vector.broadcast %cst_50 : f32 to vector<8x128xf32>
    %112 = arith.subf %111, %93 : vector<8x128xf32>
    %113 = arith.mulf %112, %82 : vector<8x128xf32>
    %114 = arith.addf %110, %113 : vector<8x128xf32>
    %115 = arith.mulf %93, %109 : vector<8x128xf32>
    %cst_51 = arith.constant 1.000000e+00 : f32
    %116 = vector.broadcast %cst_51 : f32 to vector<8x128xf32>
    %117 = arith.subf %116, %93 : vector<8x128xf32>
    %118 = arith.mulf %117, %87 : vector<8x128xf32>
    %119 = arith.addf %115, %118 : vector<8x128xf32>
    %c3_i32 = arith.constant 3 : i32
    %c8_i32_52 = arith.constant 8 : i32
    %120 = arith.muli %c3_i32, %c8_i32_52 : i32
    %121 = tpu.assume_multiple %120, 8 : i32
    %122 = arith.index_cast %121 : i32 to index
    %c0_53 = arith.constant 0 : index
    %123 = vector.load %arg17[%122, %c0_53] : memref<64x128xf32, #tpu.memory_space<vmem>>, vector<8x128xf32>
    %124 = arith.index_cast %121 : i32 to index
    %c0_54 = arith.constant 0 : index
    %125 = vector.load %arg1[%124, %c0_54] : memref<64x128xf32, #tpu.memory_space<vmem>>, vector<8x128xf32>
    %cst_55 = arith.constant dense<0.000000e+00> : vector<8x128xf32>
    %126 = tpu.matmul %119, %22, %cst_55 {dimension_numbers = #tpu.dot_dimension_numbers<[1], [0], [0], [1], [0, 0, 1, 1], [], []>} : vector<8x128xf32>, vector<128x128xf32>, vector<8x128xf32> -> vector<8x128xf32>
    %127 = arith.addf %123, %126 : vector<8x128xf32>
    %128 = arith.negf %127 : vector<8x128xf32>
    %129 = math.exp %128 : vector<8x128xf32>
    %cst_56 = arith.constant 1.000000e+00 : f32
    %130 = vector.broadcast %cst_56 : f32 to vector<8x128xf32>
    %131 = arith.addf %130, %129 : vector<8x128xf32>
    %132 = arith.divf %130, %131 : vector<8x128xf32>
    %133 = math.tanh %127 : vector<8x128xf32>
    %c96_i32_57 = arith.constant 96 : i32
    %134 = tpu.dynamic_rotate %132 by %c96_i32_57 dim 1 : vector<8x128xf32>, i32 -> vector<8x128xf32>
    %c64_i32_58 = arith.constant 64 : i32
    %135 = tpu.dynamic_rotate %133 by %c64_i32_58 dim 1 : vector<8x128xf32>, i32 -> vector<8x128xf32>
    %c32_i32_59 = arith.constant 32 : i32
    %136 = tpu.dynamic_rotate %132 by %c32_i32_59 dim 1 : vector<8x128xf32>, i32 -> vector<8x128xf32>
    %137 = arith.mulf %134, %114 : vector<8x128xf32>
    %138 = arith.mulf %132, %135 : vector<8x128xf32>
    %139 = arith.addf %137, %138 : vector<8x128xf32>
    %140 = math.tanh %139 : vector<8x128xf32>
    %141 = arith.mulf %136, %140 : vector<8x128xf32>
    %142 = arith.mulf %125, %139 : vector<8x128xf32>
    %cst_60 = arith.constant 1.000000e+00 : f32
    %143 = vector.broadcast %cst_60 : f32 to vector<8x128xf32>
    %144 = arith.subf %143, %125 : vector<8x128xf32>
    %145 = arith.mulf %144, %114 : vector<8x128xf32>
    %146 = arith.addf %142, %145 : vector<8x128xf32>
    %147 = arith.mulf %125, %141 : vector<8x128xf32>
    %cst_61 = arith.constant 1.000000e+00 : f32
    %148 = vector.broadcast %cst_61 : f32 to vector<8x128xf32>
    %149 = arith.subf %148, %125 : vector<8x128xf32>
    %150 = arith.mulf %149, %119 : vector<8x128xf32>
    %151 = arith.addf %147, %150 : vector<8x128xf32>
    %c4_i32 = arith.constant 4 : i32
    %c8_i32_62 = arith.constant 8 : i32
    %152 = arith.muli %c4_i32, %c8_i32_62 : i32
    %153 = tpu.assume_multiple %152, 8 : i32
    %154 = arith.index_cast %153 : i32 to index
    %c0_63 = arith.constant 0 : index
    %155 = vector.load %arg17[%154, %c0_63] : memref<64x128xf32, #tpu.memory_space<vmem>>, vector<8x128xf32>
    %156 = arith.index_cast %153 : i32 to index
    %c0_64 = arith.constant 0 : index
    %157 = vector.load %arg1[%156, %c0_64] : memref<64x128xf32, #tpu.memory_space<vmem>>, vector<8x128xf32>
    %cst_65 = arith.constant dense<0.000000e+00> : vector<8x128xf32>
    %158 = tpu.matmul %151, %22, %cst_65 {dimension_numbers = #tpu.dot_dimension_numbers<[1], [0], [0], [1], [0, 0, 1, 1], [], []>} : vector<8x128xf32>, vector<128x128xf32>, vector<8x128xf32> -> vector<8x128xf32>
    %159 = arith.addf %155, %158 : vector<8x128xf32>
    %160 = arith.negf %159 : vector<8x128xf32>
    %161 = math.exp %160 : vector<8x128xf32>
    %cst_66 = arith.constant 1.000000e+00 : f32
    %162 = vector.broadcast %cst_66 : f32 to vector<8x128xf32>
    %163 = arith.addf %162, %161 : vector<8x128xf32>
    %164 = arith.divf %162, %163 : vector<8x128xf32>
    %165 = math.tanh %159 : vector<8x128xf32>
    %c96_i32_67 = arith.constant 96 : i32
    %166 = tpu.dynamic_rotate %164 by %c96_i32_67 dim 1 : vector<8x128xf32>, i32 -> vector<8x128xf32>
    %c64_i32_68 = arith.constant 64 : i32
    %167 = tpu.dynamic_rotate %165 by %c64_i32_68 dim 1 : vector<8x128xf32>, i32 -> vector<8x128xf32>
    %c32_i32_69 = arith.constant 32 : i32
    %168 = tpu.dynamic_rotate %164 by %c32_i32_69 dim 1 : vector<8x128xf32>, i32 -> vector<8x128xf32>
    %169 = arith.mulf %166, %146 : vector<8x128xf32>
    %170 = arith.mulf %164, %167 : vector<8x128xf32>
    %171 = arith.addf %169, %170 : vector<8x128xf32>
    %172 = math.tanh %171 : vector<8x128xf32>
    %173 = arith.mulf %168, %172 : vector<8x128xf32>
    %174 = arith.mulf %157, %171 : vector<8x128xf32>
    %cst_70 = arith.constant 1.000000e+00 : f32
    %175 = vector.broadcast %cst_70 : f32 to vector<8x128xf32>
    %176 = arith.subf %175, %157 : vector<8x128xf32>
    %177 = arith.mulf %176, %146 : vector<8x128xf32>
    %178 = arith.addf %174, %177 : vector<8x128xf32>
    %179 = arith.mulf %157, %173 : vector<8x128xf32>
    %cst_71 = arith.constant 1.000000e+00 : f32
    %180 = vector.broadcast %cst_71 : f32 to vector<8x128xf32>
    %181 = arith.subf %180, %157 : vector<8x128xf32>
    %182 = arith.mulf %181, %151 : vector<8x128xf32>
    %183 = arith.addf %179, %182 : vector<8x128xf32>
    %c5_i32 = arith.constant 5 : i32
    %c8_i32_72 = arith.constant 8 : i32
    %184 = arith.muli %c5_i32, %c8_i32_72 : i32
    %185 = tpu.assume_multiple %184, 8 : i32
    %186 = arith.index_cast %185 : i32 to index
    %c0_73 = arith.constant 0 : index
    %187 = vector.load %arg17[%186, %c0_73] : memref<64x128xf32, #tpu.memory_space<vmem>>, vector<8x128xf32>
    %188 = arith.index_cast %185 : i32 to index
    %c0_74 = arith.constant 0 : index
    %189 = vector.load %arg1[%188, %c0_74] : memref<64x128xf32, #tpu.memory_space<vmem>>, vector<8x128xf32>
    %cst_75 = arith.constant dense<0.000000e+00> : vector<8x128xf32>
    %190 = tpu.matmul %183, %22, %cst_75 {dimension_numbers = #tpu.dot_dimension_numbers<[1], [0], [0], [1], [0, 0, 1, 1], [], []>} : vector<8x128xf32>, vector<128x128xf32>, vector<8x128xf32> -> vector<8x128xf32>
    %191 = arith.addf %187, %190 : vector<8x128xf32>
    %192 = arith.negf %191 : vector<8x128xf32>
    %193 = math.exp %192 : vector<8x128xf32>
    %cst_76 = arith.constant 1.000000e+00 : f32
    %194 = vector.broadcast %cst_76 : f32 to vector<8x128xf32>
    %195 = arith.addf %194, %193 : vector<8x128xf32>
    %196 = arith.divf %194, %195 : vector<8x128xf32>
    %197 = math.tanh %191 : vector<8x128xf32>
    %c96_i32_77 = arith.constant 96 : i32
    %198 = tpu.dynamic_rotate %196 by %c96_i32_77 dim 1 : vector<8x128xf32>, i32 -> vector<8x128xf32>
    %c64_i32_78 = arith.constant 64 : i32
    %199 = tpu.dynamic_rotate %197 by %c64_i32_78 dim 1 : vector<8x128xf32>, i32 -> vector<8x128xf32>
    %c32_i32_79 = arith.constant 32 : i32
    %200 = tpu.dynamic_rotate %196 by %c32_i32_79 dim 1 : vector<8x128xf32>, i32 -> vector<8x128xf32>
    %201 = arith.mulf %198, %178 : vector<8x128xf32>
    %202 = arith.mulf %196, %199 : vector<8x128xf32>
    %203 = arith.addf %201, %202 : vector<8x128xf32>
    %204 = math.tanh %203 : vector<8x128xf32>
    %205 = arith.mulf %200, %204 : vector<8x128xf32>
    %206 = arith.mulf %189, %203 : vector<8x128xf32>
    %cst_80 = arith.constant 1.000000e+00 : f32
    %207 = vector.broadcast %cst_80 : f32 to vector<8x128xf32>
    %208 = arith.subf %207, %189 : vector<8x128xf32>
    %209 = arith.mulf %208, %178 : vector<8x128xf32>
    %210 = arith.addf %206, %209 : vector<8x128xf32>
    %211 = arith.mulf %189, %205 : vector<8x128xf32>
    %cst_81 = arith.constant 1.000000e+00 : f32
    %212 = vector.broadcast %cst_81 : f32 to vector<8x128xf32>
    %213 = arith.subf %212, %189 : vector<8x128xf32>
    %214 = arith.mulf %213, %183 : vector<8x128xf32>
    %215 = arith.addf %211, %214 : vector<8x128xf32>
    %c6_i32 = arith.constant 6 : i32
    %c8_i32_82 = arith.constant 8 : i32
    %216 = arith.muli %c6_i32, %c8_i32_82 : i32
    %217 = tpu.assume_multiple %216, 8 : i32
    %218 = arith.index_cast %217 : i32 to index
    %c0_83 = arith.constant 0 : index
    %219 = vector.load %arg17[%218, %c0_83] : memref<64x128xf32, #tpu.memory_space<vmem>>, vector<8x128xf32>
    %220 = arith.index_cast %217 : i32 to index
    %c0_84 = arith.constant 0 : index
    %221 = vector.load %arg1[%220, %c0_84] : memref<64x128xf32, #tpu.memory_space<vmem>>, vector<8x128xf32>
    %cst_85 = arith.constant dense<0.000000e+00> : vector<8x128xf32>
    %222 = tpu.matmul %215, %22, %cst_85 {dimension_numbers = #tpu.dot_dimension_numbers<[1], [0], [0], [1], [0, 0, 1, 1], [], []>} : vector<8x128xf32>, vector<128x128xf32>, vector<8x128xf32> -> vector<8x128xf32>
    %223 = arith.addf %219, %222 : vector<8x128xf32>
    %224 = arith.negf %223 : vector<8x128xf32>
    %225 = math.exp %224 : vector<8x128xf32>
    %cst_86 = arith.constant 1.000000e+00 : f32
    %226 = vector.broadcast %cst_86 : f32 to vector<8x128xf32>
    %227 = arith.addf %226, %225 : vector<8x128xf32>
    %228 = arith.divf %226, %227 : vector<8x128xf32>
    %229 = math.tanh %223 : vector<8x128xf32>
    %c96_i32_87 = arith.constant 96 : i32
    %230 = tpu.dynamic_rotate %228 by %c96_i32_87 dim 1 : vector<8x128xf32>, i32 -> vector<8x128xf32>
    %c64_i32_88 = arith.constant 64 : i32
    %231 = tpu.dynamic_rotate %229 by %c64_i32_88 dim 1 : vector<8x128xf32>, i32 -> vector<8x128xf32>
    %c32_i32_89 = arith.constant 32 : i32
    %232 = tpu.dynamic_rotate %228 by %c32_i32_89 dim 1 : vector<8x128xf32>, i32 -> vector<8x128xf32>
    %233 = arith.mulf %230, %210 : vector<8x128xf32>
    %234 = arith.mulf %228, %231 : vector<8x128xf32>
    %235 = arith.addf %233, %234 : vector<8x128xf32>
    %236 = math.tanh %235 : vector<8x128xf32>
    %237 = arith.mulf %232, %236 : vector<8x128xf32>
    %238 = arith.mulf %221, %235 : vector<8x128xf32>
    %cst_90 = arith.constant 1.000000e+00 : f32
    %239 = vector.broadcast %cst_90 : f32 to vector<8x128xf32>
    %240 = arith.subf %239, %221 : vector<8x128xf32>
    %241 = arith.mulf %240, %210 : vector<8x128xf32>
    %242 = arith.addf %238, %241 : vector<8x128xf32>
    %243 = arith.mulf %221, %237 : vector<8x128xf32>
    %cst_91 = arith.constant 1.000000e+00 : f32
    %244 = vector.broadcast %cst_91 : f32 to vector<8x128xf32>
    %245 = arith.subf %244, %221 : vector<8x128xf32>
    %246 = arith.mulf %245, %215 : vector<8x128xf32>
    %247 = arith.addf %243, %246 : vector<8x128xf32>
    %c7_i32 = arith.constant 7 : i32
    %c8_i32_92 = arith.constant 8 : i32
    %248 = arith.muli %c7_i32, %c8_i32_92 : i32
    %249 = tpu.assume_multiple %248, 8 : i32
    %250 = arith.index_cast %249 : i32 to index
    %c0_93 = arith.constant 0 : index
    %251 = vector.load %arg17[%250, %c0_93] : memref<64x128xf32, #tpu.memory_space<vmem>>, vector<8x128xf32>
    %252 = arith.index_cast %249 : i32 to index
    %c0_94 = arith.constant 0 : index
    %253 = vector.load %arg1[%252, %c0_94] : memref<64x128xf32, #tpu.memory_space<vmem>>, vector<8x128xf32>
    %cst_95 = arith.constant dense<0.000000e+00> : vector<8x128xf32>
    %254 = tpu.matmul %247, %22, %cst_95 {dimension_numbers = #tpu.dot_dimension_numbers<[1], [0], [0], [1], [0, 0, 1, 1], [], []>} : vector<8x128xf32>, vector<128x128xf32>, vector<8x128xf32> -> vector<8x128xf32>
    %255 = arith.addf %251, %254 : vector<8x128xf32>
    %256 = arith.negf %255 : vector<8x128xf32>
    %257 = math.exp %256 : vector<8x128xf32>
    %cst_96 = arith.constant 1.000000e+00 : f32
    %258 = vector.broadcast %cst_96 : f32 to vector<8x128xf32>
    %259 = arith.addf %258, %257 : vector<8x128xf32>
    %260 = arith.divf %258, %259 : vector<8x128xf32>
    %261 = math.tanh %255 : vector<8x128xf32>
    %c96_i32_97 = arith.constant 96 : i32
    %262 = tpu.dynamic_rotate %260 by %c96_i32_97 dim 1 : vector<8x128xf32>, i32 -> vector<8x128xf32>
    %c64_i32_98 = arith.constant 64 : i32
    %263 = tpu.dynamic_rotate %261 by %c64_i32_98 dim 1 : vector<8x128xf32>, i32 -> vector<8x128xf32>
    %c32_i32_99 = arith.constant 32 : i32
    %264 = tpu.dynamic_rotate %260 by %c32_i32_99 dim 1 : vector<8x128xf32>, i32 -> vector<8x128xf32>
    %265 = arith.mulf %262, %242 : vector<8x128xf32>
    %266 = arith.mulf %260, %263 : vector<8x128xf32>
    %267 = arith.addf %265, %266 : vector<8x128xf32>
    %268 = math.tanh %267 : vector<8x128xf32>
    %269 = arith.mulf %264, %268 : vector<8x128xf32>
    %270 = arith.mulf %253, %267 : vector<8x128xf32>
    %cst_100 = arith.constant 1.000000e+00 : f32
    %271 = vector.broadcast %cst_100 : f32 to vector<8x128xf32>
    %272 = arith.subf %271, %253 : vector<8x128xf32>
    %273 = arith.mulf %272, %242 : vector<8x128xf32>
    %274 = arith.addf %270, %273 : vector<8x128xf32>
    %275 = arith.mulf %253, %269 : vector<8x128xf32>
    %cst_101 = arith.constant 1.000000e+00 : f32
    %276 = vector.broadcast %cst_101 : f32 to vector<8x128xf32>
    %277 = arith.subf %276, %253 : vector<8x128xf32>
    %278 = arith.mulf %277, %247 : vector<8x128xf32>
    %279 = arith.addf %275, %278 : vector<8x128xf32>
    %c8_i32_102 = arith.constant 8 : i32
    %c0_103 = arith.constant 0 : index
    %c0_104 = arith.constant 0 : index
    %280 = vector.load %arg10[%c0_103, %c0_104] : memref<128x64xf32, #tpu.memory_space<vmem>>, vector<128x64xf32>
    %cst_105 = arith.constant dense<0.000000e+00> : vector<8x64xf32>
    %281 = tpu.matmul %279, %280, %cst_105 {dimension_numbers = #tpu.dot_dimension_numbers<[1], [0], [0], [1], [0, 0, 1, 1], [], []>} : vector<8x128xf32>, vector<128x64xf32>, vector<8x64xf32> -> vector<8x64xf32>
    %c0_106 = arith.constant 0 : index
    %c0_107 = arith.constant 0 : index
    %282 = vector.load %arg11[%c0_106, %c0_107] : memref<32x64xf32, #tpu.memory_space<vmem>>, vector<32x64xf32>
    %cst_108 = arith.constant dense<0.000000e+00> : vector<8x64xf32>
    %283 = tpu.matmul %21, %282, %cst_108 {dimension_numbers = #tpu.dot_dimension_numbers<[1], [0], [0], [1], [0, 0, 1, 1], [], []>} : vector<8x32xf32>, vector<32x64xf32>, vector<8x64xf32> -> vector<8x64xf32>
    %284 = arith.addf %281, %283 : vector<8x64xf32>
    %c0_109 = arith.constant 0 : index
    %c0_110 = arith.constant 0 : index
    %285 = vector.load %arg12[%c0_109, %c0_110] : memref<1x64xf32, #tpu.memory_space<vmem>>, vector<1x64xf32>
    %286 = vector.broadcast %285 : vector<1x64xf32> to vector<8x64xf32>
    %287 = arith.addf %284, %286 : vector<8x64xf32>
    %cst_111 = arith.constant 0.000000e+00 : f32
    %288 = vector.broadcast %cst_111 : f32 to vector<8x64xf32>
    %289 = arith.maximumf %287, %288 : vector<8x64xf32>
    %c0_112 = arith.constant 0 : index
    %c0_113 = arith.constant 0 : index
    %290 = vector.load %arg13[%c0_112, %c0_113] : memref<64x128xf32, #tpu.memory_space<vmem>>, vector<64x128xf32>
    %cst_114 = arith.constant dense<0.000000e+00> : vector<8x128xf32>
    %291 = tpu.matmul %289, %290, %cst_114 {dimension_numbers = #tpu.dot_dimension_numbers<[1], [0], [0], [1], [0, 0, 1, 1], [], []>} : vector<8x64xf32>, vector<64x128xf32>, vector<8x128xf32> -> vector<8x128xf32>
    %c0_115 = arith.constant 0 : index
    %c0_116 = arith.constant 0 : index
    %292 = vector.load %arg14[%c0_115, %c0_116] : memref<1x128xf32, #tpu.memory_space<vmem>>, vector<1x128xf32>
    %293 = vector.broadcast %292 : vector<1x128xf32> to vector<8x128xf32>
    %294 = arith.addf %291, %293 : vector<8x128xf32>
    %c0_117 = arith.constant 0 : index
    %c0_118 = arith.constant 0 : index
    %295 = vector.load %arg15[%c0_117, %c0_118] : memref<1x128xf32, #tpu.memory_space<vmem>>, vector<1x128xf32>
    %296 = vector.broadcast %295 : vector<1x128xf32> to vector<8x128xf32>
    %297 = arith.mulf %294, %296 : vector<8x128xf32>
    %298 = tpu.iota {dimensions = array<i32: 1>} : vector<8x128xi32>
    %c4_i32_119 = arith.constant 4 : i32
    %299 = vector.broadcast %c4_i32_119 : i32 to vector<8x128xi32>
    %300 = arith.cmpi slt, %298, %299 : vector<8x128xi32>
    %cst_120 = arith.constant -1.000000e+30 : f32
    %301 = vector.broadcast %cst_120 : f32 to vector<8x128xf32>
    %302 = arith.select %300, %297, %301 : vector<8x128xi1>, vector<8x128xf32>
    %cst_121 = arith.constant dense<0xFF800000> : vector<8xf32>
    %303 = vector.multi_reduction <maximumf>, %302, %cst_121 [1] : vector<8x128xf32> to vector<8xf32>
    %304 = vector.shape_cast %303 : vector<8xf32> to vector<8x1xf32>
    %305 = vector.broadcast %304 : vector<8x1xf32> to vector<8x128xf32>
    %306 = arith.subf %302, %305 : vector<8x128xf32>
    %307 = math.exp %306 : vector<8x128xf32>
    %cst_122 = arith.constant dense<0.000000e+00> : vector<8xf32>
    %308 = vector.multi_reduction <add>, %307, %cst_122 [1] : vector<8x128xf32> to vector<8xf32>
    %309 = vector.shape_cast %308 : vector<8xf32> to vector<8x1xf32>
    %310 = tpu.reciprocal %309 {approx = true} : vector<8x1xf32> -> vector<8x1xf32>
    %311 = vector.broadcast %310 : vector<8x1xf32> to vector<8x128xf32>
    %312 = arith.mulf %307, %311 : vector<8x128xf32>
    %c0_123 = arith.constant 0 : index
    %c0_124 = arith.constant 0 : index
    %313 = vector.load %arg16[%c0_123, %c0_124] : memref<8x128xf32, #tpu.memory_space<vmem>>, vector<8x128xf32>
    tpu.vector_store %arg16[%c0_123, %c0_124], %312 {strides = array<i32>} : memref<8x128xf32, #tpu.memory_space<vmem>>, vector<8x128xf32>,
    return
  }
}

</mosaic_0001>

<bundles_post_ra>
// kernel: forward.1
= control target key start
LH: loop header
LB: loop body
LE: loop exit
PB: predicated region body
PF: predicated region fallthrough
CT: control target
= control target key end

     0   :  { %vm72_vm0 = vcmask 261120   ;;  %v2546_v3 = vmov 0.0|0.0   ;;  %vm2547_vm1 = vmmov 0   ;;  %v2548_v4 = vmov 0.0   ;;  %s2550_s26 = smov 96   ;;  %s3211_s4 = inlined_call_operand.vmem [shape: f32[32,128], index: 4, kind: input, shape index: {}]   ;;  %s3212_s0 = inlined_call_operand.vmem [shape: f32[64,32], index: 0, kind: input, shape index: {}]   ;;  %s3213_s7 = inlined_call_operand.vmem [shape: f32[64,32], index: 7, kind: input, shape index: {}]   ;;  %s3214_s8 = inlined_call_operand.vmem [shape: f32[64,32], index: 8, kind: input, shape index: {}]   ;;  %s3215_s3 = inlined_call_operand.vmem [shape: f32[8,4,64], index: 3, kind: input, shape index: {}]   ;;  %s3216_s2 = inlined_call_operand.vmem [shape: f32[8,64], index: 2, kind: input, shape index: {}]   ;;  %s3217_s5 = inlined_call_operand.vmem [shape: f32[128,128], index: 5, kind: input, shape index: {}]   ;;  %s3218_s6 = inlined_call_operand.vmem [shape: f32[1,128], index: 6, kind: input, shape index: {}]   ;;  %s3219_s1 = inlined_call_operand.vmem [shape: f32[64,128], index: 1, kind: input, shape index: {}]   ;;  %s3220_s11 = inlined_call_operand.vmem [shape: f32[32,64], index: 11, kind: input, shape index: {}]   ;;  %s3221_s9 = inlined_call_operand.vmem [shape: f32[1,32], index: 9, kind: input, shape index: {}]   ;;  %s3222_s10 = inlined_call_operand.vmem [shape: f32[128,64], index: 10, kind: input, shape index: {}]   ;;  %s3223_s13 = inlined_call_operand.vmem [shape: f32[64,128], index: 13, kind: input, shape index: {}]   ;;  %s3224_s12 = inlined_call_operand.vmem [shape: f32[1,64], index: 12, kind: input, shape index: {}]   ;;  %s3225_s14 = inlined_call_operand.vmem [shape: f32[1,128], index: 14, kind: input, shape index: {}]   ;;  %s3226_s15 = inlined_call_operand.vmem [shape: f32[1,128], index: 15, kind: input, shape index: {}]   ;;  %s3227_s16 = inlined_call_operand.vmem [shape: f32[8,128], index: 16, kind: output, shape index: {}]  }
   0x1   :  { %3229 = sst [smem:[#allocation3_spill]] %s3211_s4  ;;  %2226 = vmatprep.subr.bf16.mxu0 %v2546_v3  ;;  %1858 = vmatprep.mubr.msk.f32.mxu0 %vm2547_vm1, %v2548_v4  ;;  %v53_v7 = vld [vmem:[%s3212_s0] sm:$0xff]  ;;  %v286_v10 = vld [vmem:[%s3213_s7 + $0x8] sm:$0xff]  ;;  %v287_v12 = vld [vmem:[%s3213_s7 + $0x10] sm:$0xff]  ;;  %vm218_vm2 = vcmask 519168   ;;  %vm323_vm3 = vcmask 523264  }
   0x2   :  { %s3230_s23 = sld [smem:[#allocation3_spill]]  ;;  %1811 = vmatprep.mubr.msk.f32.mxu1 %vm72_vm0, %v53_v7  ;;  %v285_v9 = vld [vmem:[%s3213_s7] sm:$0xff]  ;;  %v294_v14 = vld [vmem:[%s3214_s8 + $0x8] sm:$0xff]  ;;  %v288_v15 = vld [vmem:[%s3213_s7 + $0x18] sm:$0xff]  ;;  %vm309_vm4 = vcmask 1041409   ;;  %vm311_vm5 = vcmask 1042434  }
   0x3   :  { %v2227_v11 = vpack.c.bf16 %v286_v10, %v285_v9  ;;  %v293_v13 = vld [vmem:[%s3214_s8] sm:$0xff]  ;;  %v54_v16 = vld [vmem:[%s3212_s0 + $0x8] sm:$0xff]  ;;  %v295_v17 = vld [vmem:[%s3214_s8 + $0x10] sm:$0xff]  ;;  %v2230_v19 = vpack.c.bf16 %v288_v15, %v287_v12  ;;  %vm313_vm6 = vcmask 1043459   ;;  %vm315_vm7 = vcmask 1044484  }
   0x4   :  { %v296_v18 = vld [vmem:[%s3214_s8 + $0x18] sm:$0xff]  ;;  %v2686_v20 = vld [vmem:[%s3214_s8 + $0x20] sm:$0xff]  ;;  %v55_v21 = vld [vmem:[%s3212_s0 + $0x10] sm:$0xff]  ;;  %v2215_v25 = vpack.c.bf16 %v294_v14, %v293_v13  ;;  %vm317_vm8 = vcmask 1045509   ;;  %vm319_vm9 = vcmask 1046534   ;;  %vm321_vm10 = vcmask 1047559  }
   0x5   :  { %2228 = vmatpush3.bf16.msra.mxu0 %v2227_v11  ;;  %v2695_v22 = vld [vmem:[%s3214_s8 + $0x28] sm:$0xff]  ;;  %v289_v23 = vld [vmem:[%s3213_s7 + $0x20] sm:$0xff]  ;;  %v2706_v26 = vld [vmem:[%s3214_s8 + $0x30] sm:$0xff]  ;;  %v2218_v32 = vpack.c.bf16 %v296_v18, %v295_v17 }
   0x6   :  { %2229 = vmatprep.subr.bf16.mxu0 %v2546_v3  ;;  %v290_v24 = vld [vmem:[%s3213_s7 + $0x28] sm:$0xff]  ;;  %v2711_v27 = vld [vmem:[%s3214_s8 + $0x38] sm:$0xff]  ;;  %v291_v28 = vld [vmem:[%s3213_s7 + $0x30] sm:$0xff]  ;;  %v2221_v37 = vpack.c.bf16 %v2695_v22, %v2686_v20  ;;  %s2551_s8 = smov 64  }
   0x7   :  { %v292_v29 = vld [vmem:[%s3213_s7 + $0x38] sm:$0xff]  ;;  %v210_v30 = vld [vmem:[%s3215_s3] sm:$0xf]  ;;  %v211_v31 = vld [vmem:[%s3215_s3 + $0x4] sm:$0xf]  ;;  %v2233_v33 = vpack.c.bf16 %v290_v24, %v289_v23  ;;  %v2224_v38 = vpack.c.bf16 %v2711_v27, %v2706_v26 }
   0x8   :  { %v61_v0 = vld [vmem:[%s3230_s23] sm:$0xff]  ;;  %v62_v1 = vld [vmem:[%s3230_s23 + $0x8] sm:$0xff]  ;;  %v63_v2 = vld [vmem:[%s3230_s23 + $0x10] sm:$0xff]  ;;  %v2236_v39 = vpack.c.bf16 %v292_v29, %v291_v28  ;;  %v219_v44 = vsel %vm218_vm2, %v210_v30, 0.0  ;;  %v226_v45 = vsel %vm218_vm2, %v211_v31, 0.0 }
   0x9   :  { %v2206_v5 = vpack.c.bf16 %v62_v1, %v61_v0  ;;  %v64_v6 = vld [vmem:[%s3230_s23 + $0x18] sm:$0xff]  ;;  %2231 = vmatpush3.bf16.msra.mxu0 %v2230_v19  ;;  %v212_v34 = vld [vmem:[%s3215_s3 + $0x8] sm:$0xf]  ;;  %v213_v35 = vld [vmem:[%s3215_s3 + $0xc] sm:$0xf]  ;;  %v220_v49 = vrot.slane %v219_v44, 4 }
   0xa   :  { %v2210_v8 = vpack.c.bf16 %v64_v6, %v63_v2  ;;  %v214_v36 = vld [vmem:[%s3215_s3 + $0x10] sm:$0xf]  ;;  %2232 = vmatprep.subr.bf16.mxu0 %v2546_v3  ;;  %v215_v40 = vld [vmem:[%s3215_s3 + $0x14] sm:$0xf]  ;;  %v216_v41 = vld [vmem:[%s3215_s3 + $0x18] sm:$0xf] }
   0xb   :  { %2207 = vmatprep.subr.bf16.mxu1 %v2206_v5  ;;  %v217_v42 = vld [vmem:[%s3215_s3 + $0x1c] sm:$0xf]  ;;  %v233_v46 = vsel %vm218_vm2, %v212_v34, 0.0  ;;  %v240_v47 = vsel %vm218_vm2, %v213_v35, 0.0  ;;  %v57_v48 = vld [vmem:[%s3212_s0 + $0x20] sm:$0xff]  ;;  %v227_v50 = vrot.slane %v226_v45, 4  ;;  %v221_v57 = vadd.f32 %v220_v49, %v219_v44 }
   0xc   :  { %2209 = vmatpush3.bf16.msra.mxu1 %v2206_v5  ;;  %v56_v43 = vld [vmem:[%s3212_s0 + $0x18] sm:$0xff]  ;;  %v234_v51 = vrot.slane %v233_v46, 4  ;;  %v241_v52 = vrot.slane %v240_v47, 4  ;;  %v247_v53 = vsel %vm218_vm2, %v214_v36, 0.0  ;;  %v254_v54 = vsel %vm218_vm2, %v215_v40, 0.0  ;;  %v58_v61 = vld [vmem:[%s3212_s0 + $0x28] sm:$0xff] }
   0xd   :  { %2211 = vmatprep.subr.bf16.mxu1 %v2210_v8  ;;  %2234 = vmatpush3.bf16.msra.mxu0 %v2233_v33  ;;  %v261_v55 = vsel %vm218_vm2, %v216_v41, 0.0  ;;  %v268_v56 = vsel %vm218_vm2, %v217_v42, 0.0  ;;  %v228_v58 = vadd.f32 %v227_v50, %v226_v45  ;;  %v248_v60 = vrot.slane %v247_v53, 4  ;;  %v59_v2 = vld [vmem:[%s3212_s0 + $0x30] sm:$0xff]  ;;  %v284_v13 = vld [vmem:[%s3216_s2] sm:$0xff]  ;;  %v60_v18 = vld [vmem:[%s3212_s0 + $0x38] sm:$0xff] }
   0xe   :  { %2235 = vmatprep.subr.bf16.mxu0 %v2546_v3  ;;  %v235_v59 = vadd.f32 %v234_v51, %v233_v46  ;;  %v242_v62 = vadd.f32 %v241_v52, %v240_v47  ;;  %v255_v63 = vrot.slane %v254_v54, 4  ;;  %v262_v0 = vrot.slane %v261_v55, 4  ;;  %v478_v42 = vld [vmem:[%s3217_s5] sm:$0xff] }
   0xf   :  { %v269_v1 = vrot.slane %v268_v56, 4  ;;  %v222_v5 = vrot.slane %v221_v57, 2  ;;  %v229_v6 = vrot.slane %v228_v58, 2 }
  0x10   :  { %2213 = vmatpush3.bf16.msra.mxu1 %v2210_v8  ;;  %v236_v7 = vrot.slane %v235_v59, 2  ;;  %v249_v8 = vadd.f32 %v248_v60, %v247_v53  ;;  %v243_v9 = vrot.slane %v242_v62, 2  ;;  %v256_v10 = vadd.f32 %v255_v63, %v254_v54  ;;  %v482_v63 = vld [vmem:[%s3217_s5 + $0x20] sm:$0xff] }
  0x11   :  { %2214 = vmatprep.subr.bf16.mxu1 %v2546_v3  ;;  %2237 = vmatpush3.bf16.msra.mxu0 %v2236_v39  ;;  %v263_v11 = vadd.f32 %v262_v0, %v261_v55  ;;  %v270_v12 = vadd.f32 %v269_v1, %v268_v56  ;;  %v223_v14 = vadd.f32 %v222_v5, %v221_v57  ;;  %v480_v55 = vld [vmem:[%s3217_s5 + $0x10] sm:$0xff]  ;;  %v481_v56 = vld [vmem:[%s3217_s5 + $0x18] sm:$0xff]  ;;  %v483_v0 = vld [vmem:[%s3217_s5 + $0x28] sm:$0xff] }
  0x12   :  { %v230_v15 = vadd.f32 %v229_v6, %v228_v58  ;;  %v250_v17 = vrot.slane %v249_v8, 2  ;;  %2262 = vmatprep.subr.bf16.mxu0 %v2546_v3  ;;  %v244_v19 = vadd.f32 %v243_v9, %v242_v62  ;;  %v257_v20 = vrot.slane %v256_v10, 2  ;;  %v484_v5 = vld [vmem:[%s3217_s5 + $0x30] sm:$0xff]  ;;  %v485_v6 = vld [vmem:[%s3217_s5 + $0x38] sm:$0xff]  ;;  %v487_v9 = vld [vmem:[%s3217_s5 + $0x48] sm:$0xff] }
  0x13   :  { %1812 = vmatmul.mubr.msk.f32.vlgmr.msra.gmra.mrb[0].mxu1 %vm72_vm0, %v54_v16  ;;  %v237_v16 = vadd.f32 %v236_v7, %v235_v59  ;;  %v271_v22 = vrot.slane %v270_v12, 2  ;;  %v224_v23 = vrot.slane %v223_v14, 1  ;;  %v2841_v7 = vpack.c.bf16 %v485_v6, %v484_v5 }
  0x14   :  { %2216 = vmatpush3.bf16.msra.mxu1 %v2215_v25  ;;  %1814 = vmatprep.mubr.msk.f32.mxu1 %vm72_vm0, %v55_v21  ;;  %v264_v21 = vrot.slane %v263_v11, 2  ;;  %v231_v24 = vrot.slane %v230_v15, 1  ;;  %v251_v28 = vadd.f32 %v250_v17, %v249_v8  ;;  %v245_v29 = vrot.slane %v244_v19, 1  ;;  %v486_v8 = vld [vmem:[%s3217_s5 + $0x40] sm:$0xff]  ;;  %v492_v17 = vld [vmem:[%s3217_s5 + $0x70] sm:$0xff] }
  0x15   :  { %2217 = vmatprep.subr.bf16.mxu1 %v2546_v3  ;;  %v238_v25 = vrot.slane %v237_v16, 1  ;;  %1859 = vmatmul.mubr.msk.f32.vlgmr.msra.gmra.mrb[0].mxu0 %vm323_vm3, %v284_v13  ;;  %v258_v30 = vadd.f32 %v257_v20, %v256_v10  ;;  %v225_v33 = vadd.f32 %v224_v23, %v223_v14  ;;  %v2853_v10 = vpack.c.bf16 %v487_v9, %v486_v8  ;;  %v490_v14 = vld [vmem:[%s3217_s5 + $0x60] sm:$0xff] }
  0x16   :  { %v265_v31 = vadd.f32 %v264_v21, %v263_v11  ;;  %1928 = vmatprep.mubr.msk.f32.mxu0 %vm2547_vm1, %v2548_v4  ;;  %v232_v34 = vadd.f32 %v231_v24, %v230_v15  ;;  %v252_v36 = vrot.slane %v251_v28, 1  ;;  %v488_v11 = vld [vmem:[%s3217_s5 + $0x50] sm:$0xff]  ;;  %v491_v15 = vld [vmem:[%s3217_s5 + $0x68] sm:$0xff]  ;;  %v1574_v20 = vld [vmem:[%s3218_s6] ss:$0 sm:$0xff]  ;;  %s2549_s6 = smov 32  }
  0x17   :  { %1815 = vmatmul.mubr.msk.f32.gmra.mrb[2].mxu1 %vm72_vm0, %v56_v43  ;;  %v239_v35 = vadd.f32 %v238_v25, %v237_v16  ;;  %v259_v39 = vrot.slane %v258_v30, 1  ;;  %v479_v43 = vld [vmem:[%s3217_s5 + $0x8] sm:$0xff]  ;;  %v276_v45 = vmul.f32 0.25, %v225_v33  ;;  %v2877_v16 = vpack.c.bf16 %v491_v15, %v490_v14 }
  0x18   :  { %2219 = vmatpush3.bf16.msra.mxu1 %v2218_v32  ;;  %1817 = vmatprep.mubr.msk.f32.mxu1 %vm72_vm0, %v57_v48  ;;  %v272_v32 = vadd.f32 %v271_v22, %v270_v12  ;;  %v266_v40 = vrot.slane %v265_v31, 1  ;;  %v253_v44 = vadd.f32 %v252_v36, %v251_v28  ;;  %v277_v46 = vmul.f32 0.25, %v232_v34  ;;  %v489_v12 = vld [vmem:[%s3217_s5 + $0x58] sm:$0xff] }
  0x19   :  { %2220 = vmatprep.subr.bf16.mxu1 %v2546_v3  ;;  %v278_v26 = vmul.f32 0.25, %v239_v35  ;;  %v260_v27 = vadd.f32 %v259_v39, %v258_v30  ;;  %v2803_v51 = vpack.c.bf16 %v479_v43, %v478_v42  ;;  %v2865_v13 = vpack.c.bf16 %v489_v12, %v488_v11 }
  0x1a   :  { %v273_v41 = vrot.slane %v272_v32, 1  ;;  %v280_v49 = vmul.f32 0.25, %v253_v44  ;;  %v310_v50 = vsel %vm309_vm4, %v277_v46, %v276_v45 }
  0x1b   :  { %1818 = vmatmul.mubr.msk.f32.gmra.mrb[4].mxu1 %vm72_vm0, %v58_v61  ;;  %v281_v52 = vmul.f32 0.25, %v260_v27  ;;  %v312_v54 = vsel %vm311_vm5, %v278_v26, %v310_v50  ;;  %2264 = vmatpush3.bf16.msra.mxu0 %v2803_v51  ;;  %v2815_v61 = vpack.c.bf16 %v481_v56, %v480_v55 }
  0x1c   :  { %2222 = vmatpush3.bf16.msra.mxu1 %v2221_v37  ;;  %1820 = vmatprep.mubr.msk.f32.mxu1 %vm72_vm0, %v59_v2  ;;  %v246_v37 = vadd.f32 %v245_v29, %v244_v19  ;;  %v274_v47 = vadd.f32 %v273_v41, %v272_v32  ;;  %v2827_v2 = vpack.c.bf16 %v483_v0, %v482_v63 }
  0x1d   :  { %2223 = vmatprep.subr.bf16.mxu1 %v2546_v3  ;;  %2265 = vmatprep.subr.bf16.mxu0 %v2546_v3 }
  0x1e   :  { %v279_v48 = vmul.f32 0.25, %v246_v37  ;;  %v283_v57 = vmul.f32 0.25, %v274_v47 }
  0x1f   :  { %1821 = vmatmul.mubr.msk.f32.gmra.mrb[6].mxu1 %vm72_vm0, %v60_v18  ;;  %2267 = vmatpush3.bf16.msra.mxu0 %v2815_v61  ;;  %v493_v18 = vld [vmem:[%s3217_s5 + $0x78] sm:$0xff] }
  0x20   :  { %2225 = vmatpush3.bf16.msra.mxu1 %v2224_v38  ;;  %1839 = vmatprep.mubr.msk.f32.mxu1 %vm2547_vm1, %v2548_v4  ;;  %v267_v38 = vadd.f32 %v266_v40, %v265_v31  ;;  %v314_v58 = vsel %vm313_vm6, %v279_v48, %v312_v54  ;;  %v2889_v19 = vpack.c.bf16 %v493_v18, %v492_v17 }
  0x21   :  { %2238 = vmatprep.subr.bf16.mxu1 %v2546_v3  ;;  %v316_v59 = vsel %vm315_vm7, %v280_v49, %v314_v58  ;;  %2268 = vmatprep.subr.bf16.mxu0 %v2546_v3 }
  0x22   :  { %v282_v53 = vmul.f32 0.25, %v267_v38  ;;  %v318_v60 = vsel %vm317_vm8, %v281_v52, %v316_v59  ;;  %v495_v52 = vld [vmem:[%s3219_s1] sm:$0xff] }
  0x23   :  { %2270 = vmatpush3.bf16.msra.mxu0 %v2827_v2 }
  0x24   :  { %v320_v62 = vsel %vm319_vm9, %v282_v53, %v318_v60  ;;  %2271 = vmatprep.subr.bf16.mxu0 %v2546_v3  ;;  %v586_v53 = vsub.f32 1.0, %v495_v52 }
  0x25   :  { %v322_v1 = vsel %vm321_vm10, %v283_v57, %v320_v62 }
  0x26   :  { %1840 = vmatmul.mubr.msk.f32.vlgmr.msra.gmra.mrb[8].mxu1 %vm323_vm3, %v322_v1  ;;  %v587_v58 = vmul.f32 0.0, %v586_v53 }
  0x27   :  { %2240 = vmatpush3.bf16.msra.mxu1 %v2803_v51  ;;  %1893 = vmatprep.mubr.msk.f32.mxu1 %vm2547_vm1, %v2548_v4 }
  0x28   :  { %2241 = vmatprep.subr.bf16.mxu1 %v2546_v3  ;;  %2273 = vmatpush3.bf16.msra.mxu0 %v2841_v7 }
  0x29   :  { %2274 = vmatprep.subr.bf16.mxu0 %v2546_v3 }
  0x2b   :  { %2243 = vmatpush3.bf16.msra.mxu1 %v2815_v61 }
  0x2c   :  { %2244 = vmatprep.subr.bf16.mxu1 %v2546_v3  ;;  %2276 = vmatpush3.bf16.msra.mxu0 %v2853_v10 }
  0x2d   :  { %2277 = vmatprep.subr.bf16.mxu0 %v2546_v3 }
  0x2f   :  { %2246 = vmatpush3.bf16.msra.mxu1 %v2827_v2 }
  0x30   :  { %2247 = vmatprep.subr.bf16.mxu1 %v2546_v3  ;;  %2279 = vmatpush3.bf16.msra.mxu0 %v2865_v13 }
  0x31   :  { %2280 = vmatprep.subr.bf16.mxu0 %v2546_v3 }
  0x33   :  { %2249 = vmatpush3.bf16.msra.mxu1 %v2841_v7 }
  0x34   :  { %2250 = vmatprep.subr.bf16.mxu1 %v2546_v3  ;;  %2282 = vmatpush3.bf16.msra.mxu0 %v2877_v16 }
  0x35   :  { %2283 = vmatprep.subr.bf16.mxu0 %v2546_v3 }
  0x37   :  { %2252 = vmatpush3.bf16.msra.mxu1 %v2853_v10 }
  0x38   :  { %2253 = vmatprep.subr.bf16.mxu1 %v2546_v3  ;;  %2285 = vmatpush3.bf16.msra.mxu0 %v2889_v19 }
  0x39   :  { %2310 = vmatprep.subr.bf16.mxu0 %v2546_v3 }
  0x3b   :  { %2255 = vmatpush3.bf16.msra.mxu1 %v2865_v13 }
  0x3c   :  { %2256 = vmatprep.subr.bf16.mxu1 %v2546_v3 }
  0x3f   :  { %2258 = vmatpush3.bf16.msra.mxu1 %v2877_v16 }
  0x40   :  { %2259 = vmatprep.subr.bf16.mxu1 %v2546_v3 }
  0x43   :  { %2261 = vmatpush3.bf16.msra.mxu1 %v2889_v19 }
  0x44   :  { %2286 = vmatprep.subr.bf16.mxu1 %v2546_v3 }
  0x46   :  { %1894 = vmatmul.mubr.f32.vlgmr.msra.gmra.mrb[10].mxu1 %v2548_v4 }
  0x47   :  { %2288 = vmatpush3.bf16.msra.mxu1 %v2803_v51  ;;  %1963 = vmatprep.mubr.msk.f32.mxu1 %vm2547_vm1, %v2548_v4 }
  0x48   :  { %2289 = vmatprep.subr.bf16.mxu1 %v2546_v3 }
  0x4b   :  { %2291 = vmatpush3.bf16.msra.mxu1 %v2815_v61 }
  0x4c   :  { %2292 = vmatprep.subr.bf16.mxu1 %v2546_v3 }
  0x4f   :  { %2294 = vmatpush3.bf16.msra.mxu1 %v2827_v2 }
  0x50   :  { %2295 = vmatprep.subr.bf16.mxu1 %v2546_v3 }
  0x53   :  { %2297 = vmatpush3.bf16.msra.mxu1 %v2841_v7 }
  0x54   :  { %2298 = vmatprep.subr.bf16.mxu1 %v2546_v3 }
  0x57   :  { %2300 = vmatpush3.bf16.msra.mxu1 %v2853_v10 }
  0x58   :  { %2301 = vmatprep.subr.bf16.mxu1 %v2546_v3 }
  0x5b   :  { %2303 = vmatpush3.bf16.msra.mxu1 %v2865_v13 }
  0x5c   :  { %2304 = vmatprep.subr.bf16.mxu1 %v2546_v3 }
  0x5f   :  { %2306 = vmatpush3.bf16.msra.mxu1 %v2877_v16 }
  0x60   :  { %2307 = vmatprep.subr.bf16.mxu1 %v2546_v3 }
  0x63   :  { %2309 = vmatpush3.bf16.msra.mxu1 %v2889_v19 }
  0x64   :  { %2334 = vmatprep.subr.bf16.mxu1 %v2546_v3 }
  0xe6   :  { %v1813_v21 = vpop.f32.mrb[0].mxu1 }
  0xe7   :  { %v2920_v22 = vadd.f32 %v1813_v21, %v1574_v20  ;;  %v163_v23 = vpop.f32.mrb[1].mxu1 }
  0xe8   :  { %v465_v34 = vpop.f32.mrb[0].mxu0  ;;  %v164_v44 = vadd.f32 %v1574_v20, %v163_v23 }
  0xe9   :  { %v1860_v35 = vpop.f32.mrb[1].mxu0 }
  0xea   :  { %v1816_v24 = vpop.f32.mrb[2].mxu1 }
  0xeb   :  { %v2922_v25 = vadd.f32 %v1816_v24, %v1574_v20  ;;  %v173_v28 = vpop.f32.mrb[3].mxu1 }
  0xec   :  { %v2924_v29 = vadd.f32 %v1574_v20, %v173_v28 }
  0xee   :  { %v1819_v30 = vpop.f32.mrb[4].mxu1 }
  0xef   :  { %v2926_v31 = vadd.f32 %v1819_v30, %v1574_v20  ;;  %v183_v32 = vpop.f32.mrb[5].mxu1 }
  0xf0   :  { %v2928_v33 = vadd.f32 %v1574_v20, %v183_v32 }
  0xf2   :  { %v1822_v36 = vpop.f32.mrb[6].mxu1 }
  0xf3   :  { %v2930_v37 = vadd.f32 %v1822_v36, %v1574_v20  ;;  %v193_v39 = vpop.f32.mrb[7].mxu1 }
  0xf4   :  { %v2932_v40 = vadd.f32 %v1574_v20, %v193_v39  ;;  %v1587_v20 = vld [vmem:[%s3219_s1 + $0x8] sm:$0xff] }
  0xf5   :  { %v685_v24 = vsub.f32 1.0, %v1587_v20 }
  0xf9   :  { %v392_v41 = vpop.f32.mrb[8].mxu1 }
  0xfa   :  { %v1841_v42 = vpop.f32.mrb[9].mxu1  ;;  %v2934_v43 = vadd.f32 %v465_v34, %v392_v41 }
 0x119   :  { %v562_v45 = vpop.f32.mrb[10].mxu1 }
 0x11a   :  { %v566_v46 = vadd.f32 %v562_v45, %v164_v44  ;;  %v1895_v26 = vpop.f32.mrb[11].mxu1 }
 0x11c   :  { %v1586_v27 = vmul.f32 -1.442695, %v566_v46 }
 0x11e   :  { %2478 = vpow2.f32 %v1586_v27 }
 0x128   :  { %v2479_v38 = vpop.eup %2478 }
 0x129   :  { %v570_v47 = vadd.f32 1.0, %v2479_v38 }
 0x12b   :  { %2480 = vrcp.f32 %v570_v47 }
 0x12c   :  { %2482 = vtanh.f32 %v566_v46 }
 0x135   :  { %v2481_v48 = vpop.eup %2480 }
 0x136   :  { %578 = vrot.lane.b32.xlu1 %v2481_v48, %s2549_s6  ;;  %574 = vrot.lane.b32.xlu0 %v2481_v48, %s2550_s26  ;;  %v2483_v49 = vpop.eup %2482 }
 0x13a   :  { %576 = vrot.lane.b32.xlu0 %v2483_v49, %s2551_s8 }
 0x1a8   :  { %v575_v50 = vpop.permute.xlu0 %574  ;;  %v579_v63 = vpop.permute.xlu1 %578 }
 0x1a9   :  { %v580_v55 = vmul.f32 0.0, %v575_v50 }
 0x1ac   :  { %v577_v54 = vpop.permute.xlu0 %576 }
 0x1ad   :  { %v581_v56 = vmul.f32 %v2481_v48, %v577_v54 }
 0x1af   :  { %v582_v57 = vadd.f32 %v581_v56, %v580_v55 }
 0x1b1   :  { %2484 = vtanh.f32 %v582_v57  ;;  %v585_v59 = vmul.f32 %v582_v57, %v495_v52 }
 0x1b3   :  { %v588_v60 = vadd.f32 %v587_v58, %v585_v59 }
 0x1b5   :  { %v686_v32 = vmul.f32 %v685_v24, %v588_v60 }
 0x1bb   :  { %v2485_v62 = vpop.eup %2484 }
 0x1bc   :  { %v584_v0 = vmul.f32 %v2485_v62, %v579_v63 }
 0x1be   :  { %v589_v1 = vmul.f32 %v584_v0, %v495_v52 }
 0x1c0   :  { %v590_v5 = vadd.f32 %v589_v1, %v587_v58 }
 0x1c2   :  { %1929 = vmatmul.mubr.f32.vlgmr.msra.gmra.mrb[2].mxu0 %v590_v5  ;;  %v689_v41 = vmul.f32 %v685_v24, %v590_v5 }
 0x1c3   :  { %2312 = vmatpush3.bf16.msra.mxu0 %v2803_v51  ;;  %1998 = vmatprep.mubr.msk.f32.mxu0 %vm2547_vm1, %v2548_v4 }
 0x1c4   :  { %2313 = vmatprep.subr.bf16.mxu0 %v2546_v3 }
 0x1c7   :  { %2315 = vmatpush3.bf16.msra.mxu0 %v2815_v61 }
 0x1c8   :  { %2316 = vmatprep.subr.bf16.mxu0 %v2546_v3 }
 0x1cb   :  { %2318 = vmatpush3.bf16.msra.mxu0 %v2827_v2 }
 0x1cc   :  { %2319 = vmatprep.subr.bf16.mxu0 %v2546_v3 }
 0x1cf   :  { %2321 = vmatpush3.bf16.msra.mxu0 %v2841_v7 }
 0x1d0   :  { %2322 = vmatprep.subr.bf16.mxu0 %v2546_v3 }
 0x1d3   :  { %2324 = vmatpush3.bf16.msra.mxu0 %v2853_v10 }
 0x1d4   :  { %2325 = vmatprep.subr.bf16.mxu0 %v2546_v3 }
 0x1d7   :  { %2327 = vmatpush3.bf16.msra.mxu0 %v2865_v13 }
 0x1d8   :  { %2328 = vmatprep.subr.bf16.mxu0 %v2546_v3 }
 0x1db   :  { %2330 = vmatpush3.bf16.msra.mxu0 %v2877_v16 }
 0x1dc   :  { %2331 = vmatprep.subr.bf16.mxu0 %v2546_v3 }
 0x1df   :  { %2333 = vmatpush3.bf16.msra.mxu0 %v2889_v19 }
 0x1e0   :  { %2358 = vmatprep.subr.bf16.mxu0 %v2546_v3 }
 0x295   :  { %v661_v6 = vpop.f32.mrb[2].mxu0 }
 0x296   :  { %v665_v8 = vadd.f32 %v661_v6, %v2920_v22  ;;  %v1930_v9 = vpop.f32.mrb[3].mxu0 }
 0x298   :  { %v1588_v11 = vmul.f32 -1.442695, %v665_v8  ;;  %2486 = vtanh.f32 %v665_v8 }
 0x29a   :  { %2488 = vpow2.f32 %v1588_v11 }
 0x2a2   :  { %v2487_v12 = vpop.eup %2486 }
 0x2a3   :  { %675 = vrot.lane.b32.xlu0 %v2487_v12, %s2551_s8 }
 0x2a4   :  { %v2489_v14 = vpop.eup %2488 }
 0x2a5   :  { %v669_v15 = vadd.f32 1.0, %v2489_v14 }
 0x2a7   :  { %2490 = vrcp.f32 %v669_v15 }
 0x2b1   :  { %v2491_v17 = vpop.eup %2490 }
 0x2b2   :  { %673 = vrot.lane.b32.xlu1 %v2491_v17, %s2550_s26 }
 0x2b6   :  { %677 = vrot.lane.b32.xlu1 %v2491_v17, %s2549_s6 }
 0x315   :  { %v676_v18 = vpop.permute.xlu0 %675 }
 0x316   :  { %v680_v22 = vmul.f32 %v2491_v17, %v676_v18 }
 0x324   :  { %v674_v21 = vpop.permute.xlu1 %673 }
 0x325   :  { %v679_v23 = vmul.f32 %v674_v21, %v588_v60 }
 0x327   :  { %v681_v28 = vadd.f32 %v680_v22, %v679_v23 }
 0x328   :  { %v678_v36 = vpop.permute.xlu1 %677 }
 0x329   :  { %2492 = vtanh.f32 %v681_v28  ;;  %v684_v30 = vmul.f32 %v1587_v20, %v681_v28 }
 0x32b   :  { %v687_v34 = vadd.f32 %v686_v32, %v684_v30 }
 0x333   :  { %v2493_v35 = vpop.eup %2492 }
 0x334   :  { %v683_v39 = vmul.f32 %v2493_v35, %v678_v36 }
 0x336   :  { %v688_v42 = vmul.f32 %v1587_v20, %v683_v39 }
 0x338   :  { %v690_v44 = vadd.f32 %v689_v41, %v688_v42 }
 0x33a   :  { %1964 = vmatmul.mubr.f32.vlgmr.msra.gmra.mrb[12].mxu1 %v690_v44 }
 0x33b   :  { %2336 = vmatpush3.bf16.msra.mxu1 %v2803_v51  ;;  %2033 = vmatprep.mubr.msk.f32.mxu1 %vm2547_vm1, %v2548_v4 }
 0x33c   :  { %2337 = vmatprep.subr.bf16.mxu1 %v2546_v3 }
 0x33f   :  { %2339 = vmatpush3.bf16.msra.mxu1 %v2815_v61 }
 0x340   :  { %2340 = vmatprep.subr.bf16.mxu1 %v2546_v3 }
 0x343   :  { %2342 = vmatpush3.bf16.msra.mxu1 %v2827_v2 }
 0x344   :  { %2343 = vmatprep.subr.bf16.mxu1 %v2546_v3 }
 0x347   :  { %2345 = vmatpush3.bf16.msra.mxu1 %v2841_v7 }
 0x348   :  { %2346 = vmatprep.subr.bf16.mxu1 %v2546_v3 }
 0x34b   :  { %2348 = vmatpush3.bf16.msra.mxu1 %v2853_v10 }
 0x34c   :  { %2349 = vmatprep.subr.bf16.mxu1 %v2546_v3 }
 0x34f   :  { %2351 = vmatpush3.bf16.msra.mxu1 %v2865_v13 }
 0x350   :  { %2352 = vmatprep.subr.bf16.mxu1 %v2546_v3 }
 0x353   :  { %2354 = vmatpush3.bf16.msra.mxu1 %v2877_v16 }
 0x354   :  { %2355 = vmatprep.subr.bf16.mxu1 %v2546_v3 }
 0x357   :  { %2357 = vmatpush3.bf16.msra.mxu1 %v2889_v19 }
 0x358   :  { %2382 = vmatprep.subr.bf16.mxu1 %v2546_v3 }
 0x40d   :  { %v761_v45 = vpop.f32.mrb[12].mxu1 }
 0x40e   :  { %v765_v46 = vadd.f32 %v761_v45, %v2924_v29  ;;  %v1965_v26 = vpop.f32.mrb[13].mxu1  ;;  %v1589_v29 = vld [vmem:[%s3219_s1 + $0x10] sm:$0xff] }
 0x40f   :  { %v785_v55 = vsub.f32 1.0, %v1589_v29 }
 0x410   :  { %v1590_v27 = vmul.f32 -1.442695, %v765_v46  ;;  %2494 = vtanh.f32 %v765_v46 }
 0x411   :  { %v786_v58 = vmul.f32 %v785_v55, %v687_v34  ;;  %v789_v0 = vmul.f32 %v785_v55, %v690_v44 }
 0x412   :  { %2496 = vpow2.f32 %v1590_v27 }
 0x41a   :  { %v2495_v38 = vpop.eup %2494 }
 0x41b   :  { %775 = vrot.lane.b32.xlu1 %v2495_v38, %s2551_s8 }
 0x41c   :  { %v2497_v47 = vpop.eup %2496 }
 0x41d   :  { %v769_v48 = vadd.f32 1.0, %v2497_v47 }
 0x41f   :  { %2498 = vrcp.f32 %v769_v48 }
 0x429   :  { %v2499_v49 = vpop.eup %2498 }
 0x42a   :  { %773 = vrot.lane.b32.xlu0 %v2499_v49, %s2550_s26 }
 0x42e   :  { %777 = vrot.lane.b32.xlu0 %v2499_v49, %s2549_s6 }
 0x48d   :  { %v776_v50 = vpop.permute.xlu1 %775 }
 0x48e   :  { %v780_v53 = vmul.f32 %v2499_v49, %v776_v50 }
 0x49c   :  { %v774_v52 = vpop.permute.xlu0 %773 }
 0x49d   :  { %v779_v54 = vmul.f32 %v774_v52, %v687_v34 }
 0x49f   :  { %v781_v56 = vadd.f32 %v780_v53, %v779_v54 }
 0x4a0   :  { %v778_v62 = vpop.permute.xlu0 %777 }
 0x4a1   :  { %2500 = vtanh.f32 %v781_v56  ;;  %v784_v57 = vmul.f32 %v1589_v29, %v781_v56 }
 0x4a3   :  { %v787_v59 = vadd.f32 %v786_v58, %v784_v57 }
 0x4ab   :  { %v2501_v60 = vpop.eup %2500 }
 0x4ac   :  { %v783_v63 = vmul.f32 %v2501_v60, %v778_v62 }
 0x4ae   :  { %v788_v1 = vmul.f32 %v1589_v29, %v783_v63 }
 0x4b0   :  { %v790_v5 = vadd.f32 %v789_v0, %v788_v1 }
 0x4b2   :  { %1999 = vmatmul.mubr.f32.vlgmr.msra.gmra.mrb[4].mxu0 %v790_v5 }
 0x4b3   :  { %2360 = vmatpush3.bf16.msra.mxu0 %v2803_v51  ;;  %2068 = vmatprep.mubr.msk.f32.mxu0 %vm2547_vm1, %v2548_v4 }
 0x4b4   :  { %2361 = vmatprep.subr.bf16.mxu0 %v2546_v3 }
 0x4b7   :  { %2363 = vmatpush3.bf16.msra.mxu0 %v2815_v61 }
 0x4b8   :  { %2364 = vmatprep.subr.bf16.mxu0 %v2546_v3 }
 0x4bb   :  { %2366 = vmatpush3.bf16.msra.mxu0 %v2827_v2 }
 0x4bc   :  { %2367 = vmatprep.subr.bf16.mxu0 %v2546_v3 }
 0x4bf   :  { %2369 = vmatpush3.bf16.msra.mxu0 %v2841_v7 }
 0x4c0   :  { %2370 = vmatprep.subr.bf16.mxu0 %v2546_v3 }
 0x4c3   :  { %2372 = vmatpush3.bf16.msra.mxu0 %v2853_v10 }
 0x4c4   :  { %2373 = vmatprep.subr.bf16.mxu0 %v2546_v3 }
 0x4c7   :  { %2375 = vmatpush3.bf16.msra.mxu0 %v2865_v13 }
 0x4c8   :  { %2376 = vmatprep.subr.bf16.mxu0 %v2546_v3 }
 0x4cb   :  { %2378 = vmatpush3.bf16.msra.mxu0 %v2877_v16 }
 0x4cc   :  { %2379 = vmatprep.subr.bf16.mxu0 %v2546_v3 }
 0x4cf   :  { %2381 = vmatpush3.bf16.msra.mxu0 %v2889_v19 }
 0x4d0   :  { %2406 = vmatprep.subr.bf16.mxu0 %v2546_v3 }
 0x585   :  { %v861_v6 = vpop.f32.mrb[4].mxu0 }
 0x586   :  { %v865_v8 = vadd.f32 %v861_v6, %v2922_v25  ;;  %v2000_v9 = vpop.f32.mrb[5].mxu0  ;;  %v1591_v25 = vld [vmem:[%s3219_s1 + $0x18] sm:$0xff] }
 0x587   :  { %v885_v23 = vsub.f32 1.0, %v1591_v25 }
 0x588   :  { %v1592_v11 = vmul.f32 -1.442695, %v865_v8  ;;  %2502 = vtanh.f32 %v865_v8 }
 0x589   :  { %v886_v30 = vmul.f32 %v885_v23, %v787_v59  ;;  %v889_v39 = vmul.f32 %v885_v23, %v790_v5 }
 0x58a   :  { %2504 = vpow2.f32 %v1592_v11 }
 0x592   :  { %v2503_v12 = vpop.eup %2502 }
 0x593   :  { %875 = vrot.lane.b32.xlu0 %v2503_v12, %s2551_s8 }
 0x594   :  { %v2505_v14 = vpop.eup %2504 }
 0x595   :  { %v869_v15 = vadd.f32 1.0, %v2505_v14 }
 0x597   :  { %2506 = vrcp.f32 %v869_v15 }
 0x5a1   :  { %v2507_v17 = vpop.eup %2506 }
 0x5a2   :  { %873 = vrot.lane.b32.xlu1 %v2507_v17, %s2550_s26 }
 0x5a6   :  { %877 = vrot.lane.b32.xlu1 %v2507_v17, %s2549_s6 }
 0x605   :  { %v876_v18 = vpop.permute.xlu0 %875 }
 0x606   :  { %v880_v21 = vmul.f32 %v2507_v17, %v876_v18 }
 0x614   :  { %v874_v20 = vpop.permute.xlu1 %873 }
 0x615   :  { %v879_v22 = vmul.f32 %v874_v20, %v787_v59  ;;  %v1304_v20 = vld [vmem:[%s3220_s11] sm:$0xff] }
 0x617   :  { %v881_v24 = vadd.f32 %v880_v21, %v879_v22  ;;  %v1305_v21 = vld [vmem:[%s3220_s11 + $0x8] sm:$0xff] }
 0x618   :  { %v878_v35 = vpop.permute.xlu1 %877 }
 0x619   :  { %2508 = vtanh.f32 %v881_v24  ;;  %v884_v28 = vmul.f32 %v1591_v25, %v881_v24  ;;  %v2431_v24 = vpack.c.bf16 %v1305_v21, %v1304_v20  ;;  %v1300_v21 = vld [vmem:[%s3222_s10 + $0x60] sm:$0xff] }
 0x61b   :  { %v887_v32 = vadd.f32 %v886_v30, %v884_v28  ;;  %v1306_v30 = vld [vmem:[%s3220_s11 + $0x10] sm:$0xff] }
 0x623   :  { %v2509_v34 = vpop.eup %2508 }
 0x624   :  { %v883_v36 = vmul.f32 %v2509_v34, %v878_v35  ;;  %v1585_v34 = vld [vmem:[%s3221_s9] ss:$0 sm:$0xff] }
 0x626   :  { %v888_v41 = vmul.f32 %v1591_v25, %v883_v36  ;;  %v476_v36 = vadd.f32 %v1585_v34, %v2934_v43  ;;  %v1461_v34 = vld [vmem:[%s3223_s13 + $0x8] sm:$0xff] }
 0x628   :  { %v890_v42 = vadd.f32 %v889_v39, %v888_v41  ;;  %v477_v39 = vmax.f32 %v476_v36, 0.0 }
 0x62a   :  { %2034 = vmatmul.mubr.f32.vlgmr.msra.gmra.mrb[14].mxu1 %v890_v42 }
 0x62b   :  { %2384 = vmatpush3.bf16.msra.mxu1 %v2803_v51  ;;  %2103 = vmatprep.mubr.msk.f32.mxu1 %vm2547_vm1, %v2548_v4 }
 0x62c   :  { %2385 = vmatprep.subr.bf16.mxu1 %v2546_v3 }
 0x62f   :  { %2387 = vmatpush3.bf16.msra.mxu1 %v2815_v61 }
 0x630   :  { %2388 = vmatprep.subr.bf16.mxu1 %v2546_v3 }
 0x633   :  { %2390 = vmatpush3.bf16.msra.mxu1 %v2827_v2 }
 0x634   :  { %2391 = vmatprep.subr.bf16.mxu1 %v2546_v3 }
 0x637   :  { %2393 = vmatpush3.bf16.msra.mxu1 %v2841_v7 }
 0x638   :  { %2394 = vmatprep.subr.bf16.mxu1 %v2546_v3 }
 0x63b   :  { %2396 = vmatpush3.bf16.msra.mxu1 %v2853_v10 }
 0x63c   :  { %2397 = vmatprep.subr.bf16.mxu1 %v2546_v3 }
 0x63f   :  { %2399 = vmatpush3.bf16.msra.mxu1 %v2865_v13 }
 0x640   :  { %2400 = vmatprep.subr.bf16.mxu1 %v2546_v3 }
 0x643   :  { %2402 = vmatpush3.bf16.msra.mxu1 %v2877_v16 }
 0x644   :  { %2403 = vmatprep.subr.bf16.mxu1 %v2546_v3 }
 0x647   :  { %2405 = vmatpush3.bf16.msra.mxu1 %v2889_v19 }
 0x648   :  { %2430 = vmatprep.subr.bf16.mxu1 %v2546_v3 }
 0x6fd   :  { %v961_v44 = vpop.f32.mrb[14].mxu1 }
 0x6fe   :  { %v965_v45 = vadd.f32 %v961_v44, %v2928_v33  ;;  %v2035_v46 = vpop.f32.mrb[15].mxu1  ;;  %v1593_v33 = vld [vmem:[%s3219_s1 + $0x20] sm:$0xff] }
 0x6ff   :  { %v985_v53 = vsub.f32 1.0, %v1593_v33 }
 0x700   :  { %v1594_v26 = vmul.f32 -1.442695, %v965_v45  ;;  %2510 = vtanh.f32 %v965_v45 }
 0x701   :  { %v986_v56 = vmul.f32 %v985_v53, %v887_v32  ;;  %v989_v62 = vmul.f32 %v985_v53, %v890_v42 }
 0x702   :  { %2512 = vpow2.f32 %v1594_v26 }
 0x70a   :  { %v2511_v27 = vpop.eup %2510 }
 0x70b   :  { %975 = vrot.lane.b32.xlu1 %v2511_v27, %s2551_s8 }
 0x70c   :  { %v2513_v38 = vpop.eup %2512 }
 0x70d   :  { %v969_v47 = vadd.f32 1.0, %v2513_v38 }
 0x70f   :  { %2514 = vrcp.f32 %v969_v47 }
 0x719   :  { %v2515_v48 = vpop.eup %2514 }
 0x71a   :  { %973 = vrot.lane.b32.xlu0 %v2515_v48, %s2550_s26 }
 0x71e   :  { %977 = vrot.lane.b32.xlu0 %v2515_v48, %s2549_s6 }
 0x77d   :  { %v976_v49 = vpop.permute.xlu1 %975 }
 0x77e   :  { %v980_v29 = vmul.f32 %v2515_v48, %v976_v49 }
 0x78c   :  { %v974_v50 = vpop.permute.xlu0 %973 }
 0x78d   :  { %v979_v52 = vmul.f32 %v974_v50, %v887_v32  ;;  %v1307_v32 = vld [vmem:[%s3220_s11 + $0x18] sm:$0xff] }
 0x78e   :  { %v2434_v35 = vpack.c.bf16 %v1307_v32, %v1306_v30  ;;  %v1460_v32 = vld [vmem:[%s3223_s13] sm:$0xff] }
 0x78f   :  { %v981_v54 = vadd.f32 %v980_v29, %v979_v52  ;;  %v2461_v36 = vpack.c.bf16 %v1461_v34, %v1460_v32 }
 0x790   :  { %v978_v59 = vpop.permute.xlu0 %977 }
 0x791   :  { %2516 = vtanh.f32 %v981_v54  ;;  %v984_v55 = vmul.f32 %v1593_v33, %v981_v54 }
 0x793   :  { %v987_v57 = vadd.f32 %v986_v56, %v984_v55 }
 0x79b   :  { %v2517_v58 = vpop.eup %2516 }
 0x79c   :  { %v983_v60 = vmul.f32 %v2517_v58, %v978_v59 }
 0x79e   :  { %v988_v63 = vmul.f32 %v1593_v33, %v983_v60 }
 0x7a0   :  { %v990_v0 = vadd.f32 %v989_v62, %v988_v63 }
 0x7a2   :  { %2069 = vmatmul.mubr.f32.vlgmr.msra.gmra.mrb[6].mxu0 %v990_v0 }
 0x7a3   :  { %2408 = vmatpush3.bf16.msra.mxu0 %v2803_v51  ;;  %2138 = vmatprep.mubr.msk.f32.mxu0 %vm2547_vm1, %v2548_v4 }
 0x7a4   :  { %2409 = vmatprep.subr.bf16.mxu0 %v2546_v3 }
 0x7a7   :  { %2411 = vmatpush3.bf16.msra.mxu0 %v2815_v61 }
 0x7a8   :  { %2412 = vmatprep.subr.bf16.mxu0 %v2546_v3 }
 0x7ab   :  { %2414 = vmatpush3.bf16.msra.mxu0 %v2827_v2 }
 0x7ac   :  { %2415 = vmatprep.subr.bf16.mxu0 %v2546_v3 }
 0x7af   :  { %2417 = vmatpush3.bf16.msra.mxu0 %v2841_v7 }
 0x7b0   :  { %2418 = vmatprep.subr.bf16.mxu0 %v2546_v3 }
 0x7b3   :  { %2420 = vmatpush3.bf16.msra.mxu0 %v2853_v10 }
 0x7b4   :  { %2421 = vmatprep.subr.bf16.mxu0 %v2546_v3 }
 0x7b7   :  { %2423 = vmatpush3.bf16.msra.mxu0 %v2865_v13 }
 0x7b8   :  { %2424 = vmatprep.subr.bf16.mxu0 %v2546_v3 }
 0x7bb   :  { %2426 = vmatpush3.bf16.msra.mxu0 %v2877_v16 }
 0x7bc   :  { %2427 = vmatprep.subr.bf16.mxu0 %v2546_v3 }
 0x7bf   :  { %2429 = vmatpush3.bf16.msra.mxu0 %v2889_v19 }
 0x7c0   :  { %2436 = vmatprep.subr.bf16.mxu0 %v2546_v3 }
 0x875   :  { %v1061_v51 = vpop.f32.mrb[6].mxu0 }
 0x876   :  { %v1065_v61 = vadd.f32 %v1061_v51, %v2926_v31  ;;  %v2070_v2 = vpop.f32.mrb[7].mxu0  ;;  %v1595_v31 = vld [vmem:[%s3219_s1 + $0x28] sm:$0xff] }
 0x877   :  { %v1085_v9 = vsub.f32 1.0, %v1595_v31  ;;  %v1289_v2 = vld [vmem:[%s3222_s10 + $0x8] sm:$0xff] }
 0x878   :  { %v1596_v7 = vmul.f32 -1.442695, %v1065_v61  ;;  %2518 = vtanh.f32 %v1065_v61  ;;  %v1288_v61 = vld [vmem:[%s3222_s10] sm:$0xff] }
 0x879   :  { %v1086_v14 = vmul.f32 %v1085_v9, %v987_v57  ;;  %v1089_v22 = vmul.f32 %v1085_v9, %v990_v0  ;;  %v1295_v9 = vld [vmem:[%s3222_s10 + $0x38] sm:$0xff] }
 0x87a   :  { %2520 = vpow2.f32 %v1596_v7  ;;  %v1290_v7 = vld [vmem:[%s3222_s10 + $0x10] sm:$0xff] }
 0x882   :  { %v2519_v10 = vpop.eup %2518 }
 0x883   :  { %1075 = vrot.lane.b32.xlu0 %v2519_v10, %s2551_s8 }
 0x884   :  { %v2521_v13 = vpop.eup %2520 }
 0x885   :  { %v1069_v1 = vadd.f32 1.0, %v2521_v13  ;;  %v2437_v13 = vpack.c.bf16 %v1289_v2, %v1288_v61  ;;  %v1605_v2 = vld [vmem:[%s3226_s15] ss:$0 sm:$0xff] }
 0x887   :  { %2522 = vrcp.f32 %v1069_v1  ;;  %v1292_v1 = vld [vmem:[%s3222_s10 + $0x20] sm:$0xff] }
 0x891   :  { %v2523_v16 = vpop.eup %2522 }
 0x892   :  { %1073 = vrot.lane.b32.xlu1 %v2523_v16, %s2550_s26 }
 0x896   :  { %1077 = vrot.lane.b32.xlu1 %v2523_v16, %s2549_s6 }
 0x8f5   :  { %v1076_v19 = vpop.permute.xlu0 %1075 }
 0x8f6   :  { %v1080_v6 = vmul.f32 %v2523_v16, %v1076_v19  ;;  %v1293_v16 = vld [vmem:[%s3222_s10 + $0x28] sm:$0xff] }
 0x8f7   :  { %v2443_v19 = vpack.c.bf16 %v1293_v16, %v1292_v1 }
 0x904   :  { %v1074_v5 = vpop.permute.xlu1 %1073 }
 0x905   :  { %v1079_v8 = vmul.f32 %v1074_v5, %v987_v57 }
 0x907   :  { %v1081_v11 = vadd.f32 %v1080_v6, %v1079_v8  ;;  %v1294_v8 = vld [vmem:[%s3222_s10 + $0x30] sm:$0xff] }
 0x908   :  { %v1078_v18 = vpop.permute.xlu1 %1077 }
 0x909   :  { %2524 = vtanh.f32 %v1081_v11  ;;  %v1084_v12 = vmul.f32 %v1595_v31, %v1081_v11  ;;  %v2446_v11 = vpack.c.bf16 %v1295_v9, %v1294_v8 }
 0x90b   :  { %v1087_v15 = vadd.f32 %v1086_v14, %v1084_v12  ;;  %v1296_v12 = vld [vmem:[%s3222_s10 + $0x40] sm:$0xff]  ;;  %v1297_v14 = vld [vmem:[%s3222_s10 + $0x48] sm:$0xff] }
 0x913   :  { %v2525_v17 = vpop.eup %2524 }
 0x914   :  { %v1083_v25 = vmul.f32 %v2525_v17, %v1078_v18  ;;  %v1298_v17 = vld [vmem:[%s3222_s10 + $0x50] sm:$0xff]  ;;  %v1299_v18 = vld [vmem:[%s3222_s10 + $0x58] sm:$0xff] }
 0x916   :  { %v1088_v23 = vmul.f32 %v1595_v31, %v1083_v25  ;;  %v2452_v25 = vpack.c.bf16 %v1299_v18, %v1298_v17 }
 0x918   :  { %v1090_v28 = vadd.f32 %v1089_v22, %v1088_v23  ;;  %v1301_v22 = vld [vmem:[%s3222_s10 + $0x68] sm:$0xff] }
 0x919   :  { %v2455_v23 = vpack.c.bf16 %v1301_v22, %v1300_v21 }
 0x91a   :  { %2104 = vmatmul.mubr.f32.vlgmr.msra.gmra.mrb[16].mxu1 %v1090_v28 }
 0x91b   :  { %2432 = vmatpush3.bf16.msra.mxu1 %v2431_v24  ;;  %2149 = vmatprep.mubr.msk.f32.mxu1 %vm2547_vm1, %v2548_v4  ;;  %v1302_v24 = vld [vmem:[%s3222_s10 + $0x70] sm:$0xff] }
 0x91c   :  { %2433 = vmatprep.subr.bf16.mxu1 %v2546_v3 }
 0x91f   :  { %2435 = vmatpush3.bf16.msra.mxu1 %v2434_v35  ;;  %v1462_v35 = vld [vmem:[%s3223_s13 + $0x10] sm:$0xff] }
 0x920   :  { %2460 = vmatprep.subr.bf16.mxu1 %v2546_v3 }
 0x922   :  { %2150 = vmatmul.mubr.msk.f32.vlgmr.msra.gmra.mrb[18].mxu1 %vm72_vm0, %v477_v39  ;;  %v1463_v39 = vld [vmem:[%s3223_s13 + $0x18] sm:$0xff] }
 0x923   :  { %2203 = vmatprep.mubr.msk.f32.mxu1 %vm2547_vm1, %v2548_v4  ;;  %2462 = vmatpush3.bf16.msra.mxu1 %v2461_v36 }
 0x924   :  { %2463 = vmatprep.subr.bf16.mxu1 %v2546_v3 }
 0x9ed   :  { %v1161_v41 = vpop.f32.mrb[16].mxu1 }
 0x9ee   :  { %v1165_v42 = vadd.f32 %v1161_v41, %v2932_v40  ;;  %v2105_v44 = vpop.f32.mrb[17].mxu1  ;;  %v1597_v40 = vld [vmem:[%s3219_s1 + $0x30] sm:$0xff]  ;;  %v2464_v41 = vpack.c.bf16 %v1463_v39, %v1462_v35 }
 0x9ef   :  { %v1185_v29 = vsub.f32 1.0, %v1597_v40 }
 0x9f0   :  { %v1598_v45 = vmul.f32 -1.442695, %v1165_v42  ;;  %2526 = vtanh.f32 %v1165_v42  ;;  %2465 = vmatpush3.bf16.msra.mxu1 %v2464_v41 }
 0x9f1   :  { %v1186_v54 = vmul.f32 %v1185_v29, %v1087_v15  ;;  %v1189_v59 = vmul.f32 %v1185_v29, %v1090_v28  ;;  %v1303_v28 = vld [vmem:[%s3222_s10 + $0x78] sm:$0xff]  ;;  %2466 = vmatprep.subr.bf16.mxu1 %v2546_v3  ;;  %v1464_v29 = vld [vmem:[%s3223_s13 + $0x20] sm:$0xff] }
 0x9f2   :  { %2528 = vpow2.f32 %v1598_v45  ;;  %v2458_v30 = vpack.c.bf16 %v1303_v28, %v1302_v24 }
 0x9f5   :  { %v3091_v46 = vpop.f32.mrb[18].mxu1 }
 0x9f6   :  { %v2151_v43 = vpop.f32.mrb[19].mxu1 }
 0x9fa   :  { %v2527_v26 = vpop.eup %2526 }
 0x9fb   :  { %1175 = vrot.lane.b32.xlu1 %v2527_v26, %s2551_s8 }
 0x9fc   :  { %v2529_v27 = vpop.eup %2528 }
 0x9fd   :  { %v1169_v38 = vadd.f32 1.0, %v2529_v27  ;;  %v1599_v27 = vld [vmem:[%s3219_s1 + $0x38] sm:$0xff] }
 0x9ff   :  { %2530 = vrcp.f32 %v1169_v38  ;;  %v1285_v38 = vsub.f32 1.0, %v1599_v27 }
 0xa09   :  { %v2531_v47 = vpop.eup %2530 }
 0xa0a   :  { %1173 = vrot.lane.b32.xlu0 %v2531_v47, %s2550_s26 }
 0xa0e   :  { %1177 = vrot.lane.b32.xlu0 %v2531_v47, %s2549_s6 }
 0xa6d   :  { %v1176_v48 = vpop.permute.xlu1 %1175 }
 0xa6e   :  { %v1180_v33 = vmul.f32 %v2531_v47, %v1176_v48 }
 0xa7c   :  { %v1174_v49 = vpop.permute.xlu0 %1173 }
 0xa7d   :  { %v1179_v50 = vmul.f32 %v1174_v49, %v1087_v15  ;;  %v2449_v15 = vpack.c.bf16 %v1297_v14, %v1296_v12 }
 0xa7f   :  { %v1181_v52 = vadd.f32 %v1180_v33, %v1179_v50 }
 0xa80   :  { %v1178_v57 = vpop.permute.xlu0 %1177 }
 0xa81   :  { %2532 = vtanh.f32 %v1181_v52  ;;  %v1184_v53 = vmul.f32 %v1597_v40, %v1181_v52  ;;  %v1465_v52 = vld [vmem:[%s3223_s13 + $0x28] sm:$0xff] }
 0xa83   :  { %v3099_v55 = vadd.f32 %v1186_v54, %v1184_v53  ;;  %v2467_v53 = vpack.c.bf16 %v1465_v52, %v1464_v29  ;;  %v1466_v54 = vld [vmem:[%s3223_s13 + $0x30] sm:$0xff] }
 0xa85   :  { %2468 = vmatpush3.bf16.msra.mxu1 %v2467_v53 }
 0xa86   :  { %2469 = vmatprep.subr.bf16.mxu1 %v2546_v3 }
 0xa8b   :  { %v2533_v56 = vpop.eup %2532 }
 0xa8c   :  { %v1183_v58 = vmul.f32 %v2533_v56, %v1178_v57 }
 0xa8e   :  { %v1188_v60 = vmul.f32 %v1597_v40, %v1183_v58  ;;  %v1602_v58 = vld [vmem:[%s3224_s12] ss:$0 sm:$0xff] }
 0xa90   :  { %v3101_v62 = vadd.f32 %v1189_v59, %v1188_v60 }
 0xa92   :  { %2139 = vmatmul.mubr.f32.vlgmr.msra.gmra.mrb[8].mxu0 %v3101_v62  ;;  %v1286_v49 = vmul.f32 %v1285_v38, %v3101_v62 }
 0xa93   :  { %2184 = vmatprep.mubr.msk.f32.mxu0 %vm2547_vm1, %v2548_v4  ;;  %v1291_v4 = vld [vmem:[%s3222_s10 + $0x18] sm:$0xff]  ;;  %2438 = vmatpush3.bf16.msra.mxu0 %v2437_v13 }
 0xa94   :  { %2439 = vmatprep.subr.bf16.mxu0 %v2546_v3 }
 0xb65   :  { %v1261_v63 = vpop.f32.mrb[8].mxu0 }
 0xb66   :  { %v1265_v0 = vadd.f32 %v1261_v63, %v2930_v37  ;;  %v2140_v51 = vpop.f32.mrb[9].mxu0  ;;  %v2440_v37 = vpack.c.bf16 %v1291_v4, %v1290_v7  ;;  %v1556_v63 = vlaneseq }
 0xb68   :  { %v1600_v10 = vmul.f32 -1.442695, %v1265_v0  ;;  %2534 = vtanh.f32 %v1265_v0  ;;  %2441 = vmatpush3.bf16.msra.mxu0 %v2440_v37  ;;  %v1603_v0 = vld [vmem:[%s3225_s14] ss:$0 sm:$0xff]  ;;  %v1557_v51 = vand.u32 127, %v1556_v63 }
 0xb69   :  { %2442 = vmatprep.subr.bf16.mxu0 %v2546_v3 }
 0xb6a   :  { %2536 = vpow2.f32 %v1600_v10  ;;  %vm1558_vm11 = vcmp.lt.s32.totalorder %v1557_v51, 4 }
 0xb6c   :  { %2444 = vmatpush3.bf16.msra.mxu0 %v2443_v19 }
 0xb6d   :  { %2445 = vmatprep.subr.bf16.mxu0 %v2546_v3 }
 0xb70   :  { %2447 = vmatpush3.bf16.msra.mxu0 %v2446_v11 }
 0xb71   :  { %2448 = vmatprep.subr.bf16.mxu0 %v2546_v3 }
 0xb72   :  { %v2535_v31 = vpop.eup %2534 }
 0xb73   :  { %1275 = vrot.lane.b32.xlu0 %v2535_v31, %s2551_s8 }
 0xb74   :  { %v2537_v5 = vpop.eup %2536  ;;  %2450 = vmatpush3.bf16.msra.mxu0 %v2449_v15 }
 0xb75   :  { %v1269_v6 = vadd.f32 1.0, %v2537_v5  ;;  %2451 = vmatprep.subr.bf16.mxu0 %v2546_v3 }
 0xb77   :  { %2538 = vrcp.f32 %v1269_v6 }
 0xb78   :  { %2453 = vmatpush3.bf16.msra.mxu0 %v2452_v25 }
 0xb79   :  { %2454 = vmatprep.subr.bf16.mxu0 %v2546_v3 }
 0xb7c   :  { %2456 = vmatpush3.bf16.msra.mxu0 %v2455_v23 }
 0xb7d   :  { %2457 = vmatprep.subr.bf16.mxu0 %v2546_v3 }
 0xb80   :  { %2459 = vmatpush3.bf16.msra.mxu0 %v2458_v30 }
 0xb81   :  { %v2539_v20 = vpop.eup %2538 }
 0xb82   :  { %1273 = vrot.lane.b32.xlu1 %v2539_v20, %s2550_s26 }
 0xb86   :  { %1277 = vrot.lane.b32.xlu1 %v2539_v20, %s2549_s6 }
 0xbe5   :  { %v1276_v42 = vpop.permute.xlu0 %1275 }
 0xbe6   :  { %v1280_v45 = vmul.f32 %v2539_v20, %v1276_v42 }
 0xbf4   :  { %v1274_v44 = vpop.permute.xlu1 %1273 }
 0xbf5   :  { %v1279_v43 = vmul.f32 %v1274_v44, %v3099_v55  ;;  %v1467_v55 = vld [vmem:[%s3223_s13 + $0x38] sm:$0xff] }
 0xbf6   :  { %v2470_v56 = vpack.c.bf16 %v1467_v55, %v1466_v54 }
 0xbf7   :  { %v1281_v26 = vadd.f32 %v1280_v45, %v1279_v43 }
 0xbf8   :  { %v1278_v48 = vpop.permute.xlu1 %1277  ;;  %2471 = vmatpush3.bf16.msra.mxu1 %v2470_v56 }
 0xbf9   :  { %2540 = vtanh.f32 %v1281_v26 }
 0xc03   :  { %v2541_v47 = vpop.eup %2540 }
 0xc04   :  { %v1283_v40 = vmul.f32 %v2541_v47, %v1278_v48 }
 0xc06   :  { %v1284_v33 = vmul.f32 %v1599_v27, %v1283_v40 }
 0xc08   :  { %v1287_v50 = vadd.f32 %v1286_v49, %v1284_v33 }
 0xc0a   :  { %2185 = vmatmul.mubr.f32.vlgmr.msra.gmra.mrb[10].mxu0 %v1287_v50 }
 0xcdd   :  { %v1447_v57 = vpop.f32.mrb[10].mxu0 }
 0xcde   :  { %v1448_v59 = vadd.f32 %v1447_v57, %v3091_v46  ;;  %v2186_v60 = vpop.f32.mrb[11].mxu0 }
 0xce0   :  { %v1458_v62 = vadd.f32 %v1602_v58, %v1448_v59 }
 0xce2   :  { %v1459_v3 = vmax.f32 %v1458_v62, 0.0 }
 0xce4   :  { %2204 = vmatmul.mubr.msk.f32.vlgmr.msra.gmra.mrb[20].mxu1 %vm323_vm3, %v1459_v3 }
 0xdb7   :  { %v1544_v61 = vpop.f32.mrb[20].mxu1 }
 0xdb8   :  { %v1545_v7 = vadd.f32 %v1603_v0, %v1544_v61  ;;  %v2205_v10 = vpop.f32.mrb[21].mxu1 }
 0xdba   :  { %v1555_v46 = vmul.f32 %v1605_v2, %v1545_v7 }
 0xdbc   :  { %v1559_v13 = vsel %vm1558_vm11, %v1555_v46, -1e+30 }
 0xdbd   :  { %1560 = vmax.xlane.f32.xlu0 %v1559_v13 }
 0xe4a   :  { %v1561_v4 = vpop.xlane.xlu0 %1560 }
 0xe4b   :  { %v1562_v37 = vsub.f32 %v1559_v13, %v1561_v4 }
 0xe4d   :  { %v1563_v1 = vmul.f32 1.442695, %v1562_v37 }
 0xe4f   :  { %2542 = vpow2.f32 %v1563_v1 }
 0xe59   :  { %v2543_v16 = vpop.eup %2542 }
 0xe5a   :  { %1565 = vadd.xlane.f32.xlu1 %v2543_v16 }
 0xee7   :  { %v1566_v19 = vpop.xlane.xlu1 %1565 }
 0xee8   :  { %2544 = vrcp.f32 %v1566_v19 }
 0xef2   :  { %v2545_v31 = vpop.eup %2544 }
 0xef3   :  { %v1568_v5 = vmul.f32 %v2545_v31, %v2543_v16 }
 0xef5   :  { %1569 = vst [vmem:[%s3227_s16] sm:$0xff] %v1568_v5 }

</bundles_post_ra>
